<compile_context>
chip_gen: v7x
topology: tpu7x:2x2x1
jax: 0.10.0
libtpu: 0.0.40
codegen_flags: <defaults>
</compile_context>

<pallas_src>
import functools

import jax
import jax.numpy as jnp
from jax.experimental import pallas as pl
from jax.experimental.pallas import tpu as pltpu


def _silu(x):
    return x * jax.nn.sigmoid(x)


def mamba_block_kernel(x_ref, wt_ref, b_ref, o_ref, *, gram_chunk):
    # x_ref: (Bt, L, D) VMEM tile (compute dtype), wt_ref: (D, D) weight already
    # transposed to (in, out) layout and in compute dtype, b_ref: (1, D) f32 bias.
    bt, L, D = x_ref.shape

    wt = wt_ref[...]                             # (D, D), read once, reused 3x
    bias = b_ref[...]                            # (1, D) f32, read once (hoisted)

    def linear(t):
        # t @ w^T + b  ==  t @ wt + b.  Operands in compute dtype, f32 accumulation
        # on the MXU; plain (M,K)x(K,N) contraction -> no in-kernel RHS transpose.
        acc = jnp.dot(t.astype(wt.dtype), wt, preferred_element_type=jnp.float32)
        return acc + bias                        # bias add in f32 (VPU)

    # Two projections over the flattened (Bt*L, D) slab.
    x2 = x_ref[...].reshape(bt * L, D)
    y = linear(x2)                               # proj(x)        -> f32
    y2 = linear(y)                               # proj(proj(x))  -> f32 (cast inside)
    a = _silu(y).astype(wt.dtype).reshape(bt, L, D)    # silu in f32, Gram operands in
    c = _silu(y2).astype(wt.dtype).reshape(bt, L, D)   # compute dtype

    # Chunked Gram + final projection: s_chunk = a_chunk @ c[b]^T, then
    # out_chunk = linear(s_chunk).  Largest temporary is (gram_chunk, L) instead of
    # (bt, L, L); small static trip counts, so a Python loop is fine here.
    n_chunks = L // gram_chunk
    for b in range(bt):
        cb = c[b]                                # (L, D)
        for ci in range(n_chunks):
            r0 = ci * gram_chunk
            a_chunk = a[b, r0:r0 + gram_chunk, :]            # (chunk, D)
            s_chunk = jax.lax.dot_general(                   # a_chunk @ cb^T
                a_chunk, cb,
                dimension_numbers=(((1,), (1,)), ((), ())),
                preferred_element_type=jnp.float32)          # (chunk, L) f32
            out_chunk = linear(s_chunk)                      # (chunk, D), needs L == D
            o_ref[b, r0:r0 + gram_chunk, :] = out_chunk.astype(o_ref.dtype)


def _choose_batch_block(B, *, target_steps=4, cap=8):
    """Largest divisor of B (<= cap) keeping >= target_steps grid steps.

    >= 4 steps gives >= 2 steps per TensorCore on v7x megacore, so per-step x/out
    DMA overlaps with the previous step's compute.  Falls back to >= 2 steps, then
    1 step, for tiny batches.
    """
    if B <= 1:
        return 1
    for min_steps in (target_steps, 2, 1):
        for bt in range(min(cap, B), 0, -1):
            if B % bt == 0 and B // bt >= min_steps:
                return bt
    return 1


def mamba_block_forward(x, w, b, *, compute_dtype=jnp.bfloat16, batch_block=None,
                        gram_chunk=None):
    """x: (B, L, D), w: (D, D) PyTorch Linear weight (out, in), b: (D,) bias.

    compute_dtype=jnp.bfloat16 (default): bf16 matmul operands, f32 accumulation.
    compute_dtype=jnp.float32: exact PyTorch-parity path (slower on MXU).
    """
    B, L, D = x.shape
    assert L == D, "MambaBlock forward only type-checks when seq_len == dim"
    assert w.shape == (D, D) and b.shape == (D,)

    bt = _choose_batch_block(B) if batch_block is None else batch_block
    assert B % bt == 0, "batch must be divisible by the batch block"

    if gram_chunk is None:
        gram_chunk = 256 if L % 256 == 0 else (128 if L % 128 == 0 else L)
    assert L % gram_chunk == 0, "seq_len must be divisible by gram_chunk"

    # One-time boundary casts (fused into producers inside a larger jit):
    #  - x, w in compute dtype -> halves their HBM DMA bytes on the bf16 path and
    #    removes per-step in-kernel converts.
    #  - weight transposed to (in, out) so the kernel contracts it canonically.
    #  - bias stays f32 (accumulation / bias-add precision).
    x_in = x.astype(compute_dtype)
    w_t = jnp.transpose(w).astype(compute_dtype)
    bias = b.astype(jnp.float32).reshape(1, D)

    cdt_bytes = jnp.dtype(compute_dtype).itemsize
    out_bytes = jnp.dtype(x.dtype).itemsize
    flops = 2 * B * L * D * (3 * D + L)          # 3 projections + batched Gram
    transcendentals = 2 * B * L * D              # two SiLU sigmoids over (B, L, D)
    bytes_accessed = (B * L * D * (cdt_bytes + out_bytes)   # x in, out written back
                      + D * D * cdt_bytes + D * 4)          # weight + bias

    kernel = functools.partial(mamba_block_kernel, gram_chunk=gram_chunk)

    return pl.pallas_call(
        kernel,
        out_shape=jax.ShapeDtypeStruct((B, L, D), x.dtype),
        grid_spec=pltpu.PrefetchScalarGridSpec(
            num_scalar_prefetch=0,
            grid=(B // bt,),
            in_specs=[
                pl.BlockSpec((bt, L, D), lambda i: (i, 0, 0)),   # x batch block
                pl.BlockSpec((D, D), lambda i: (0, 0)),          # transposed weight
                pl.BlockSpec((1, D), lambda i: (0, 0)),          # bias (shared)
            ],
            out_specs=pl.BlockSpec((bt, L, D), lambda i: (i, 0, 0)),
        ),
        compiler_params=pltpu.CompilerParams(
            # Parallel batch-block axis: v7x's two TensorCores split the grid.
            dimension_semantics=("parallel",),
            # Explicit scoped-VMEM limit: safe on all of v5e/v6e/v7x (<= physical).
            # At L = D >= ~512 on v7x drop bt to 1 (batch_block=1) and shrink
            # gram_chunk; at L = D >= 1024 also tile L via an extra grid axis.
            vmem_limit_bytes=32 * 1024 * 1024,
            # TODO(synk): if a trace on v6e/v5e shows exposed per-step DMA at small
            # bt, bump the x/out BlockSpecs to pipeline_mode=pl.Buffered(3).
        ),
        cost_estimate=pl.CostEstimate(
            flops=flops,
            transcendentals=transcendentals,
            bytes_accessed=bytes_accessed,
        ),
    )(x_in, w_t, bias)


def mamba_block_reference(x, w, b):
    """Pure-JAX f32 reference mirroring the PyTorch forward exactly."""
    proj = lambda t: jnp.einsum("bld,ed->ble", t, w) + b
    y = proj(x)
    y2 = proj(y)
    a = _silu(y)
    c = _silu(y2)
    s = jnp.einsum("bld,bkd->blk", a, c)
    return proj(s)


def mamba_block_reference_mixed(x, w, b, compute_dtype):
    """Reference with the same operand-dtype / f32-accumulation scheme as the kernel."""
    wt = jnp.transpose(w).astype(compute_dtype)
    bias = b.astype(jnp.float32)

    def proj(t):
        return jnp.einsum("...d,de->...e", t.astype(compute_dtype), wt,
                          preferred_element_type=jnp.float32) + bias

    y = proj(x)
    y2 = proj(y)
    a = _silu(y).astype(compute_dtype)
    c = _silu(y2).astype(compute_dtype)
    s = jnp.einsum("bld,bkd->blk", a, c, preferred_element_type=jnp.float32)
    return proj(s)


if __name__ == "__main__":
    # Small shapes consistent with the module: seq_len == dim (required by forward).
    B, L, D = 8, 128, 128

    key = jax.random.PRNGKey(0)
    kx, kw, kb = jax.random.split(key, 3)

    x = jax.random.normal(kx, (B, L, D), dtype=jnp.float32)
    # Deterministic Linear(dim, dim) init (PyTorch-style uniform bound 1/sqrt(dim)).
    bound = 1.0 / (D ** 0.5)
    w = jax.random.uniform(kw, (D, D), minval=-bound, maxval=bound, dtype=jnp.float32)
    b = jax.random.uniform(kb, (D,), minval=-bound, maxval=bound, dtype=jnp.float32)

    ref_f32 = mamba_block_reference(x, w, b)

    # 1) Exact-precision path (f32 matmuls): PyTorch-parity option, checked tightly.
    out_f32 = jax.block_until_ready(mamba_block_forward(x, w, b, compute_dtype=jnp.float32))
    assert out_f32.shape == x.shape
    assert jnp.allclose(out_f32, ref_f32, atol=1e-3, rtol=1e-3), "f32 kernel mismatch vs reference"

    # 2) Default perf path (bf16 operands, f32 accumulation): matches a
    #    precision-matched reference tightly and the f32 reference loosely.
    out_bf16 = jax.block_until_ready(mamba_block_forward(x, w, b))
    ref_mixed = mamba_block_reference_mixed(x, w, b, jnp.bfloat16)
    assert out_bf16.shape == x.shape
    assert jnp.allclose(out_bf16, ref_mixed, atol=1e-3, rtol=1e-3), "bf16 kernel mismatch vs matched reference"
    assert jnp.allclose(out_bf16, ref_f32, atol=1e-1, rtol=1e-1), "bf16 kernel drifted too far from f32 reference"

    print("KERNEL_OK")
</pallas_src>

<mosaic_0001>
module attributes {stable_mosaic.version = 11 : i64} {
  func.func @mamba_block_kernel(%arg0: i32, %arg1: memref<2x128x128xf32, #tpu.memory_space<vmem>>, %arg2: memref<128x128xf32, #tpu.memory_space<vmem>>, %arg3: memref<1x128xf32, #tpu.memory_space<vmem>>, %arg4: memref<2x128x128xf32, #tpu.memory_space<vmem>>) attributes {dimension_semantics = [#tpu.dimension_semantics<parallel>], iteration_bounds = array<i64: 4>, scalar_prefetch = 0 : i64, scratch_operands = 0 : i64, tpu.core_type = #tpu.core_type<tc>, window_params = [{transform_indices = @transform_0, window_bounds = array<i64: 2, 128, 128>}, {pipeline_mode = #tpu.pipeline_mode<synchronous>, transform_indices = @transform_1, window_bounds = array<i64: 128, 128>}, {pipeline_mode = #tpu.pipeline_mode<synchronous>, transform_indices = @transform_2, window_bounds = array<i64: 1, 128>}, {transform_indices = @transform_3, window_bounds = array<i64: 2, 128, 128>}]} {
    %c0 = arith.constant 0 : index
    %c0_0 = arith.constant 0 : index
    %0 = vector.load %arg2[%c0, %c0_0] : memref<128x128xf32, #tpu.memory_space<vmem>>, vector<128x128xf32>
    %c0_1 = arith.constant 0 : index
    %c0_2 = arith.constant 0 : index
    %1 = vector.load %arg3[%c0_1, %c0_2] : memref<1x128xf32, #tpu.memory_space<vmem>>, vector<1x128xf32>
    %c0_3 = arith.constant 0 : index
    %c0_4 = arith.constant 0 : index
    %c0_5 = arith.constant 0 : index
    %2 = vector.load %arg1[%c0_3, %c0_4, %c0_5] : memref<2x128x128xf32, #tpu.memory_space<vmem>>, vector<2x128x128xf32>
    %3 = vector.shape_cast %2 : vector<2x128x128xf32> to vector<256x128xf32>
    %cst = arith.constant dense<0.000000e+00> : vector<256x128xf32>
    %4 = tpu.matmul %3, %0, %cst {dimension_numbers = #tpu.dot_dimension_numbers<[1], [0], [0], [1], [0, 0, 1, 1], [], []>} : vector<256x128xf32>, vector<128x128xf32>, vector<256x128xf32> -> vector<256x128xf32>
    %5 = vector.broadcast %1 : vector<1x128xf32> to vector<256x128xf32>
    %6 = arith.addf %4, %5 : vector<256x128xf32>
    %cst_6 = arith.constant dense<0.000000e+00> : vector<256x128xf32>
    %7 = tpu.matmul %6, %0, %cst_6 {dimension_numbers = #tpu.dot_dimension_numbers<[1], [0], [0], [1], [0, 0, 1, 1], [], []>} : vector<256x128xf32>, vector<128x128xf32>, vector<256x128xf32> -> vector<256x128xf32>
    %8 = vector.broadcast %1 : vector<1x128xf32> to vector<256x128xf32>
    %9 = arith.addf %7, %8 : vector<256x128xf32>
    %10 = arith.negf %6 : vector<256x128xf32>
    %11 = math.exp %10 : vector<256x128xf32>
    %cst_7 = arith.constant 1.000000e+00 : f32
    %12 = vector.broadcast %cst_7 : f32 to vector<256x128xf32>
    %13 = arith.addf %12, %11 : vector<256x128xf32>
    %14 = arith.divf %12, %13 : vector<256x128xf32>
    %15 = arith.mulf %6, %14 : vector<256x128xf32>
    %16 = vector.shape_cast %15 : vector<256x128xf32> to vector<2x128x128xf32>
    %17 = arith.negf %9 : vector<256x128xf32>
    %18 = math.exp %17 : vector<256x128xf32>
    %cst_8 = arith.constant 1.000000e+00 : f32
    %19 = vector.broadcast %cst_8 : f32 to vector<256x128xf32>
    %20 = arith.addf %19, %18 : vector<256x128xf32>
    %21 = arith.divf %19, %20 : vector<256x128xf32>
    %22 = arith.mulf %9, %21 : vector<256x128xf32>
    %23 = vector.shape_cast %22 : vector<256x128xf32> to vector<2x128x128xf32>
    %24 = vector.extract_strided_slice %23 {offsets = [0, 0, 0], sizes = [1, 128, 128], strides = [1, 1, 1]} : vector<2x128x128xf32> to vector<1x128x128xf32>
    %25 = vector.shape_cast %24 : vector<1x128x128xf32> to vector<128x128xf32>
    %26 = vector.extract_strided_slice %16 {offsets = [0, 0, 0], sizes = [1, 128, 128], strides = [1, 1, 1]} : vector<2x128x128xf32> to vector<1x128x128xf32>
    %27 = vector.shape_cast %26 : vector<1x128x128xf32> to vector<128x128xf32>
    %cst_9 = arith.constant dense<0.000000e+00> : vector<128x128xf32>
    %28 = tpu.matmul %27, %25, %cst_9 {dimension_numbers = #tpu.dot_dimension_numbers<[1], [1], [0], [0], [0, 0, 1, 0], [], []>} : vector<128x128xf32>, vector<128x128xf32>, vector<128x128xf32> -> vector<128x128xf32>
    %cst_10 = arith.constant dense<0.000000e+00> : vector<128x128xf32>
    %29 = tpu.matmul %28, %0, %cst_10 {dimension_numbers = #tpu.dot_dimension_numbers<[1], [0], [0], [1], [0, 0, 1, 1], [], []>} : vector<128x128xf32>, vector<128x128xf32>, vector<128x128xf32> -> vector<128x128xf32>
    %30 = vector.broadcast %1 : vector<1x128xf32> to vector<128x128xf32>
    %31 = arith.addf %29, %30 : vector<128x128xf32>
    %c0_11 = arith.constant 0 : index
    %c0_12 = arith.constant 0 : index
    %c0_13 = arith.constant 0 : index
    %32 = vector.load %arg4[%c0_11, %c0_12, %c0_13] : memref<2x128x128xf32, #tpu.memory_space<vmem>>, vector<1x128x128xf32>
    %33 = vector.shape_cast %32 : vector<1x128x128xf32> to vector<128x128xf32>
    %34 = vector.shape_cast %31 : vector<128x128xf32> to vector<1x128x128xf32>
    tpu.vector_store %arg4[%c0_11, %c0_12, %c0_13], %34 {strides = array<i32>} : memref<2x128x128xf32, #tpu.memory_space<vmem>>, vector<1x128x128xf32>,
    %35 = vector.extract_strided_slice %23 {offsets = [1, 0, 0], sizes = [1, 128, 128], strides = [1, 1, 1]} : vector<2x128x128xf32> to vector<1x128x128xf32>
    %36 = vector.shape_cast %35 : vector<1x128x128xf32> to vector<128x128xf32>
    %37 = vector.extract_strided_slice %16 {offsets = [1, 0, 0], sizes = [1, 128, 128], strides = [1, 1, 1]} : vector<2x128x128xf32> to vector<1x128x128xf32>
    %38 = vector.shape_cast %37 : vector<1x128x128xf32> to vector<128x128xf32>
    %cst_14 = arith.constant dense<0.000000e+00> : vector<128x128xf32>
    %39 = tpu.matmul %38, %36, %cst_14 {dimension_numbers = #tpu.dot_dimension_numbers<[1], [1], [0], [0], [0, 0, 1, 0], [], []>} : vector<128x128xf32>, vector<128x128xf32>, vector<128x128xf32> -> vector<128x128xf32>
    %cst_15 = arith.constant dense<0.000000e+00> : vector<128x128xf32>
    %40 = tpu.matmul %39, %0, %cst_15 {dimension_numbers = #tpu.dot_dimension_numbers<[1], [0], [0], [1], [0, 0, 1, 1], [], []>} : vector<128x128xf32>, vector<128x128xf32>, vector<128x128xf32> -> vector<128x128xf32>
    %41 = vector.broadcast %1 : vector<1x128xf32> to vector<128x128xf32>
    %42 = arith.addf %40, %41 : vector<128x128xf32>
    %c1 = arith.constant 1 : index
    %c0_16 = arith.constant 0 : index
    %c0_17 = arith.constant 0 : index
    %43 = vector.load %arg4[%c1, %c0_16, %c0_17] : memref<2x128x128xf32, #tpu.memory_space<vmem>>, vector<1x128x128xf32>
    %44 = vector.shape_cast %43 : vector<1x128x128xf32> to vector<128x128xf32>
    %45 = vector.shape_cast %42 : vector<128x128xf32> to vector<1x128x128xf32>
    tpu.vector_store %arg4[%c1, %c0_16, %c0_17], %45 {strides = array<i32>} : memref<2x128x128xf32, #tpu.memory_space<vmem>>, vector<1x128x128xf32>,
    return
  }
  func.func @transform_0(%arg0: i32) -> (i32, i32, i32) {
    %c0_i32 = arith.constant 0 : i32
    %c0_i32_0 = arith.constant 0 : i32
    %c0_i32_1 = arith.constant 0 : i32
    return %arg0, %c0_i32, %c0_i32_0 : i32, i32, i32
  }
  func.func @transform_1(%arg0: i32) -> (i32, i32) {
    %c0_i32 = arith.constant 0 : i32
    %c0_i32_0 = arith.constant 0 : i32
    %c0_i32_1 = arith.constant 0 : i32
    return %c0_i32, %c0_i32_0 : i32, i32
  }
  func.func @transform_2(%arg0: i32) -> (i32, i32) {
    %c0_i32 = arith.constant 0 : i32
    %c0_i32_0 = arith.constant 0 : i32
    %c0_i32_1 = arith.constant 0 : i32
    return %c0_i32, %c0_i32_0 : i32, i32
  }
  func.func @transform_3(%arg0: i32) -> (i32, i32, i32) {
    %c0_i32 = arith.constant 0 : i32
    %c0_i32_0 = arith.constant 0 : i32
    %c0_i32_1 = arith.constant 0 : i32
    return %arg0, %c0_i32, %c0_i32_0 : i32, i32, i32
  }
}

</mosaic_0001>

<bundles_post_ra>
// kernel: tpu_custom_call.1
= control target key start
LH: loop header
LB: loop body
LE: loop exit
PB: predicated region body
PF: predicated region fallthrough
CT: control target
= control target key end

     0   :  { %8 = vsyncpa [#allocation3], 0  ;;  %s4050_s0 = inlined_call_operand.hbm [shape: f32[8,128,128], index: 0, kind: input, shape index: {}]   ;;  %s4051_s1 = inlined_call_operand.hbm [shape: f32[128,128], index: 1, kind: input, shape index: {}]   ;;  %s4052_s2 = inlined_call_operand.vmem [shape: f32[1,128], index: 2, kind: input, shape index: {}]   ;;  %s4053_s3 = inlined_call_operand.hbm [shape: f32[8,128,128], index: 3, kind: output, shape index: {}]  }
   0x1   :  { %10 = vsyncpa [#allocation3 + $0x1], 0 }
   0x2   :  { %11 = vsyncpa [#allocation6], 0 }
   0x3   :  { %12 = vsyncpa [#allocation4], 0 }
   0x4   :  { %14 = vsyncpa [#allocation4 + $0x1], 0  ;;  %s3249_s12 = smov 0   ;;  %s3251_s13 = smov 0  }
   0x5   :  { %s3253_s14 = smov 0   ;;  %s3255_s15 = smov 0  }
   0x6 LB: > { %s3270_s16 = sadd.s32 4294967295, %s3220_s15   ;;  %s1871_s17 = sadd.s32 4294967294, %s3220_s15   ;;  %s3220_s15 = sphi %s3255_s15, %s4131_s15   ;;  %s3216_s14 = sphi %s3253_s14, %s4130_s14   ;;  %s3212_s13 = sphi %s3251_s13, %s4129_s13   ;;  %s3208_s12 = sphi %s3249_s12, %s4128_s12  }
   0x7   : > { %p40_p0 = scmp.ne.s32.totalorder %s3212_s13, %s3208_s12  ;;  %p4054_p1 = scmp.eq.s32.totalorder %s3270_s16, 0 }
   0x8   : > { %p112_p3 = scmp.eq.s32.totalorder %s1871_s17, 3  ;;  %p1872_p5 = scmp.ge.s32.totalorder %s3220_s15, 1 }
   0x9   : > { %p3279_p4 = por %p4054_p1, %p40_p0  ;;  %p119_p7 = scmp.lt.s32.totalorder %s3220_s15, 5 }
   0xa   : > { %p3284_p6 = por %p112_p3, %p40_p0  ;;  %s3222_s21 = smov [#allocation5]  }
   0xb   : > { %s4086_s18 = scalar_select %p3279_p4, 1, 0 }
   0xc   : > { %s4087_s19 = scalar_select %p3284_p6, 1, 0 }
   0xd   : > { %p3289_p8 = pnand %p1872_p5, %p119_p7  ;;  %s131_s22 = sshll.u32 %s3222_s21, 4  ;;  %s132_s22 = int_to_ptr.vmem [resolvable:$true] %s131_s22 }
   0xe   : > { %s3302_s24 = sadd.s32 1, %s3220_s15   ;;  %s27_s25 = sadd.s32 1, %s3216_s14 }
   0xf   : > { %s4088_s20 = scalar_select %p3289_p8, 1, 0 }
  0x10   : > { %p2782_p9 = pneg %p3289_p8  ;;  %s24_s26 = ssub.s32 %s3220_s15, %s3302_s24 }
  0x11   : > { %s3092_s29 = scalar_lea.hbm %s4051_s1, 2048 }
  0x12   : > { %p3297_p10 = pnand %p2782_p9, %p4054_p1  ;;  %p3093_p11 = scmp.ne.s32.totalorder %s4051_s1, %s3092_s29 }
  0x13   : > { %p3099_p3 = scmp.lt.u32.totalorder %s3092_s29, %s4051_s1 }
  0x14   : > { %p3094_p12 = pneg %p3297_p10 }
  0x16   : > { %p3095_p13 = pnand %p3094_p12, %p3093_p11 }
  0x18   : > { %p3096_p0 = pneg %p3095_p13 }
  0x1a   : > { %p3101_p5 = pnand %p3099_p3, %p3096_p0 }
  0x1c   : > { %3104 = shalt.err (!%p3101_p5)
}
  0x1d   : > { %s3105_s7 = scalar_lea.vmem %s132_s22, 2048  ;;  %p3113_p2 = scmp.lt.s32.totalorder %s132_s22, %s132_s22 }
  0x1e   : > { %p3106_p7 = scmp.ne.s32.totalorder %s132_s22, %s3105_s7  ;;  %p3114_p6 = scmp.lt.s32.totalorder %s3105_s7, %s3105_s7 }
  0x20   : > { %p3108_p9 = pnand %p3106_p7, %p3094_p12  ;;  %p3115_p4 = por %p3114_p6, %p3113_p2 }
  0x22   : > { %p3109_p1 = pneg %p3108_p9 }
  0x24   : > { %p3116_p8 = pnand %p3115_p4, %p3109_p1 }
  0x26   : > { %3119 = shalt.err (!%p3116_p8)
}
  0x27   : > { %s3223_s8 = smov 128   ;;  %s3224_s9 = smov 8  }
  0x28   : > { %2785 = dma.hbm_to_vmem [thread:$0]  (!%p3297_p10), %s4051_s1, 2048, %s132_s22, [#allocation6], %s3223_s8, %s3223_s8, %s3224_s9  }
  0x29   : > { %p25_p1 = scmp.eq.s32.totalorder %s24_s26, 0  ;;  %p34_p2 = scmp.ne.s32.totalorder %s3216_s14, %s3212_s13 }
  0x2a   : > { %p35_p4 = scmp.eq.s32.totalorder %s3220_s15, 0  ;;  %p2795_p6 = scmp.lt.s32.totalorder %s3220_s15, 4 }
  0x2b   : > { %s3331_s17 = scalar_select %p25_p1, %s3216_s14, %s27_s25  }
  0x2c   : > { %p36_p8 = por %p35_p4, %p34_p2  ;;  %p4090_p11 = scmp.eq.s32.totalorder %s3270_s16, 3 }
  0x2d   : > { %s148_s23 = sand.u32 1, %s3216_s14   ;;  %s1971_s27 = sshll.u32 %s3220_s15, 12 }
  0x2e   : > { %p3335_p12 = por %p4090_p11, %p34_p2  ;;  %s1875_s28 = sshll.u32 %s148_s23, 8 }
  0x2f   : > { %s3344_s4 = scalar_lea.hbm %s4050_s0, %s1971_s27  ;;  %s152_s22 = scalar_lea.vmem [#allocation2], %s1875_s28 }
  0x30   : > { %s160_s25 = sshll.u32 %s152_s22, 4  ;;  %p3346_p10 = pnand %p2795_p6, %p36_p8  ;;  %s3350_s25 = int_to_ptr.vmem [resolvable:$true] %s160_s25 }
  0x31   : > { %s3352_s5 = scalar_lea.sflag [#allocation3], %s148_s23  ;;  %s3120_s6 = scalar_lea.hbm %s3344_s4, 4096 }
  0x32   : > { %p3121_p13 = scmp.ne.s32.totalorder %s3344_s4, %s3120_s6  ;;  %p3122_p0 = pneg %p3346_p10 }
  0x33   : > { %s3125_s11 = scalar_lea.hbm %s4050_s0, 16384  ;;  %p3126_p7 = scmp.lt.u32.totalorder %s3344_s4, %s4050_s0 }
  0x34   : > { %p3123_p3 = pnand %p3122_p0, %p3121_p13  ;;  %p3127_p9 = scmp.lt.u32.totalorder %s3125_s11, %s3120_s6 }
  0x35   : > { %p3129_p2 = scmp.lt.u32.totalorder %s3120_s6, %s3344_s4 }
  0x36   : > { %p3124_p5 = pneg %p3123_p3  ;;  %p3128_p1 = por %p3127_p9, %p3126_p7 }
  0x38   : > { %p3130_p4 = por %p3129_p2, %p3128_p1 }
  0x3a   : > { %p3131_p6 = pnand %p3130_p4, %p3124_p5 }
  0x3c   : > { %3134 = shalt.err (!%p3131_p6)
}
  0x3d   : > { %s3135_s23 = scalar_lea.vmem %s3350_s25, 4096  ;;  %s3225_s29 = smov [#allocation2]  }
  0x3e   : > { %p3136_p8 = scmp.ne.s32.totalorder %s3350_s25, %s3135_s23  ;;  %s3140_s30 = sshll.u32 %s3225_s29, 4  ;;  %s3141_s30 = int_to_ptr.vmem [resolvable:$false] %s3140_s30 }
  0x3f   : > { %s3142_s22 = scalar_lea.vmem %s3141_s30, 8192  ;;  %p3143_p3 = scmp.lt.s32.totalorder %s3350_s25, %s3141_s30 }
  0x40   : > { %p3138_p11 = pnand %p3136_p8, %p3122_p0  ;;  %p3144_p7 = scmp.lt.s32.totalorder %s3142_s22, %s3135_s23 }
  0x42   : > { %p3139_p13 = pneg %p3138_p11  ;;  %p3145_p9 = por %p3144_p7, %p3143_p3 }
  0x44   : > { %p3146_p1 = pnand %p3145_p9, %p3139_p13 }
  0x46   : > { %3149 = shalt.err (!%p3146_p1)
}
  0x47   : > { %2789 = dma.hbm_to_vmem [thread:$0]  (!%p3346_p10), %s3344_s4, 4096, %s3350_s25, %s3352_s5, %s3223_s8, %s3223_s8, %s3224_s9  }
  0x48   : > { %p4093_p0 = scmp.ne.s32.totalorder %s4088_s20, 0 }
  0x4a   : > { %172 = sbr.rel (%p4093_p0) target bundleno = 1184 (0x4a0), region = 32 }
  0x51   : > { %s3386_s6 = sand.u32 1, %s3212_s13   ;;  %p4094_p5 = scmp.ne.s32.totalorder %s4086_s18, 0 }
  0x52   : > { %s1880_s7 = sshll.u32 %s3386_s6, 8  ;;  %s175_s10 = scalar_lea.sflag [#allocation3], %s3386_s6 }
  0x53   : > { %s3392_s26 = scalar_lea.vmem [#allocation2], %s1880_s7 }
  0x54   : > { %3195 = dma.done.wait (%p4094_p5), %s175_s10, 4096  }
  0x55   : > { %3197 = vsyncadd (%p4094_p5), %s175_s10, 4294963200  ;;  %p4095_p10 = scmp.eq.s32.totalorder %s3270_s16, 0 }
  0x57   : > { %3199 = dma.done.wait (%p4095_p10), [#allocation6], 2048   ;;  %p4096_p2 = pmov %p4095_p10 }
  0x58   : > { %v207_v0 = vld [vmem:[#allocation5] sm:$0xff]  ;;  %v208_v1 = vld [vmem:[#allocation5 + $0x8] sm:$0xff]  ;;  %v209_v2 = vld [vmem:[#allocation5 + $0x10] sm:$0xff]  ;;  %s3936_s4 = scalar_lea.vmem [#allocation7], %s1880_s7  ;;  %s1973_s25 = sshll.u32 %s3270_s16, 12 }
  0x59   : > { %3201 = vsyncadd (%p4096_p2), [#allocation6], 4294965248  ;;  %v3402_v3 = vpack.c.bf16 %v208_v1, %v207_v0  ;;  %v210_v4 = vld [vmem:[#allocation5 + $0x18] sm:$0xff]  ;;  %v211_v6 = vld [vmem:[#allocation5 + $0x20] sm:$0xff]  ;;  %s1788_s5 = sshll.u32 %s3936_s4, 4  ;;  %s4002_s28 = scalar_lea.hbm %s4053_s3, %s1973_s25  ;;  %s4004_s5 = int_to_ptr.vmem [resolvable:$true] %s1788_s5 }
  0x5a   : > { %v3404_v5 = vpack.c.bf16 %v210_v4, %v209_v2  ;;  %v212_v7 = vld [vmem:[#allocation5 + $0x28] sm:$0xff]  ;;  %v224_v9 = vld [vmem:[%s3392_s26] sm:$0xff]  ;;  %v213_v10 = vld [vmem:[#allocation5 + $0x30] sm:$0xff]  ;;  %s1774_s16 = scalar_lea.sflag [#allocation4], %s3386_s6  ;;  %s3150_s23 = scalar_lea.vmem %s4004_s5, 4096 }
  0x5b   : > { %4097 = vst [vmem:[#allocation11_spill] sm:$0xff] %v3402_v3  ;;  %2583 = vmatprep.subr.bf16.mxu0 %v3402_v3  ;;  %2615 = vmatprep.subr.bf16.mxu1 %v3402_v3  ;;  %v3411_v8 = vpack.c.bf16 %v212_v7, %v211_v6  ;;  %v214_v11 = vld [vmem:[#allocation5 + $0x38] sm:$0xff]  ;;  %v215_v13 = vld [vmem:[#allocation5 + $0x40] sm:$0xff]  ;;  %v216_v14 = vld [vmem:[#allocation5 + $0x48] sm:$0xff]  ;;  %p3151_p4 = scmp.ne.s32.totalorder %s4004_s5, %s3150_s23  ;;  %s3226_s29 = smov [#allocation7]  }
  0x5c   : > { %4098 = vst [vmem:[#allocation12_spill] sm:$0xff] %v3404_v5  ;;  %2585 = vmatpush3.bf16.msra.mxu0 %v3402_v3  ;;  %2617 = vmatpush3.bf16.msra.mxu1 %v3402_v3  ;;  %v3418_v12 = vpack.c.bf16 %v214_v11, %v213_v10  ;;  %v3424_v15 = vpack.c.bf16 %v216_v14, %v215_v13  ;;  %v217_v16 = vld [vmem:[#allocation5 + $0x50] sm:$0xff]  ;;  %v218_v17 = vld [vmem:[#allocation5 + $0x58] sm:$0xff]  ;;  %v219_v19 = vld [vmem:[#allocation5 + $0x60] sm:$0xff]  ;;  %s3154_s30 = sshll.u32 %s3226_s29, 4  ;;  %s3155_s30 = int_to_ptr.vmem [resolvable:$false] %s3154_s30 }
  0x5d   : > { %2587 = vmatprep.subr.bf16.mxu0 %v3404_v5  ;;  %4099 = vst [vmem:[#allocation13_spill] sm:$0xff] %v3411_v8  ;;  %2619 = vmatprep.subr.bf16.mxu1 %v3404_v5  ;;  %v3430_v18 = vpack.c.bf16 %v218_v17, %v217_v16  ;;  %v220_v20 = vld [vmem:[#allocation5 + $0x68] sm:$0xff]  ;;  %v221_v22 = vld [vmem:[#allocation5 + $0x70] sm:$0xff]  ;;  %v222_v23 = vld [vmem:[#allocation5 + $0x78] sm:$0xff]  ;;  %p3152_p6 = pnand %p3151_p4, %p3335_p12  ;;  %s3156_s22 = scalar_lea.vmem %s3155_s30, 8192 }
  0x5e   : > { %2230 = vmatprep.mubr.f32.mxu0 %v224_v9  ;;  %4100 = vst [vmem:[#allocation14_spill] sm:$0xff] %v3418_v12  ;;  %4101 = vst [vmem:[#allocation15_spill] sm:$0xff] %v3424_v15  ;;  %v3436_v21 = vpack.c.bf16 %v220_v20, %v219_v19  ;;  %v3442_v24 = vpack.c.bf16 %v222_v23, %v221_v22  ;;  %v225_v25 = vld [vmem:[%s3392_s26 + $0x8] sm:$0xff]  ;;  %v226_v26 = vld [vmem:[%s3392_s26 + $0x10] sm:$0xff]  ;;  %p3157_p11 = scmp.lt.s32.totalorder %s4004_s5, %s3155_s30  ;;  %p3158_p13 = scmp.lt.s32.totalorder %s3156_s22, %s3150_s23 }
  0x5f   : > { %4102 = vst [vmem:[#allocation16_spill] sm:$0xff] %v3430_v18  ;;  %v227_v27 = vld [vmem:[%s3392_s26 + $0x18] sm:$0xff]  ;;  %v228_v28 = vld [vmem:[%s3392_s26 + $0x20] sm:$0xff]  ;;  %v229_v29 = vld [vmem:[%s3392_s26 + $0x28] sm:$0xff]  ;;  %p3153_p8 = pneg %p3152_p6 }
  0x60   : > { %2589 = vmatpush3.bf16.msra.mxu0 %v3404_v5  ;;  %2621 = vmatpush3.bf16.msra.mxu1 %v3404_v5  ;;  %4103 = vst [vmem:[#allocation17_spill] sm:$0xff] %v3436_v21  ;;  %4104 = vst [vmem:[#allocation18_spill] sm:$0xff] %v3442_v24  ;;  %v230_v30 = vld [vmem:[%s3392_s26 + $0x30] sm:$0xff]  ;;  %v231_v31 = vld [vmem:[%s3392_s26 + $0x38] sm:$0xff]  ;;  %p3159_p3 = por %p3158_p13, %p3157_p11 }
  0x61   : > { %2591 = vmatprep.subr.bf16.mxu0 %v3411_v8  ;;  %2623 = vmatprep.subr.bf16.mxu1 %v3411_v8  ;;  %v232_v32 = vld [vmem:[%s3392_s26 + $0x40] sm:$0xff]  ;;  %v233_v33 = vld [vmem:[%s3392_s26 + $0x48] sm:$0xff]  ;;  %v234_v34 = vld [vmem:[%s3392_s26 + $0x50] sm:$0xff] }
  0x62   : > { %v235_v35 = vld [vmem:[%s3392_s26 + $0x58] sm:$0xff]  ;;  %v236_v36 = vld [vmem:[%s3392_s26 + $0x60] sm:$0xff]  ;;  %v237_v37 = vld [vmem:[%s3392_s26 + $0x68] sm:$0xff]  ;;  %p3160_p7 = pnand %p3159_p3, %p3153_p8 }
  0x63   : > { %v238_v38 = vld [vmem:[%s3392_s26 + $0x70] sm:$0xff]  ;;  %v239_v39 = vld [vmem:[%s3392_s26 + $0x78] sm:$0xff]  ;;  %v240_v40 = vld [vmem:[%s3392_s26 + $0x80] sm:$0xff] }
  0x64   : > { %2593 = vmatpush3.bf16.msra.mxu0 %v3411_v8  ;;  %2625 = vmatpush3.bf16.msra.mxu1 %v3411_v8  ;;  %v241_v41 = vld [vmem:[%s3392_s26 + $0x88] sm:$0xff]  ;;  %v242_v42 = vld [vmem:[%s3392_s26 + $0x90] sm:$0xff]  ;;  %v243_v43 = vld [vmem:[%s3392_s26 + $0x98] sm:$0xff] }
  0x65   : > { %2595 = vmatprep.subr.bf16.mxu0 %v3418_v12  ;;  %2627 = vmatprep.subr.bf16.mxu1 %v3418_v12  ;;  %v244_v44 = vld [vmem:[%s3392_s26 + $0xa0] sm:$0xff]  ;;  %v245_v45 = vld [vmem:[%s3392_s26 + $0xa8] sm:$0xff]  ;;  %v246_v46 = vld [vmem:[%s3392_s26 + $0xb0] sm:$0xff] }
  0x66   : > { %v247_v47 = vld [vmem:[%s3392_s26 + $0xb8] sm:$0xff]  ;;  %v248_v48 = vld [vmem:[%s3392_s26 + $0xc0] sm:$0xff]  ;;  %v249_v49 = vld [vmem:[%s3392_s26 + $0xc8] sm:$0xff] }
  0x67   : > { %v250_v50 = vld [vmem:[%s3392_s26 + $0xd0] sm:$0xff]  ;;  %v251_v51 = vld [vmem:[%s3392_s26 + $0xd8] sm:$0xff]  ;;  %v252_v52 = vld [vmem:[%s3392_s26 + $0xe0] sm:$0xff] }
  0x68   : > { %2597 = vmatpush3.bf16.msra.mxu0 %v3418_v12  ;;  %2629 = vmatpush3.bf16.msra.mxu1 %v3418_v12  ;;  %v253_v53 = vld [vmem:[%s3392_s26 + $0xe8] sm:$0xff]  ;;  %v254_v54 = vld [vmem:[%s3392_s26 + $0xf0] sm:$0xff]  ;;  %v255_v55 = vld [vmem:[%s3392_s26 + $0xf8] sm:$0xff] }
  0x69   : > { %2599 = vmatprep.subr.bf16.mxu0 %v3424_v15  ;;  %2631 = vmatprep.subr.bf16.mxu1 %v3424_v15  ;;  %v3486_v56 = vld [vmem:[%s4052_s2] ss:$0 sm:$0xff] }
  0x6c   : > { %2601 = vmatpush3.bf16.msra.mxu0 %v3424_v15  ;;  %2633 = vmatpush3.bf16.msra.mxu1 %v3424_v15 }
  0x6d   : > { %2603 = vmatprep.subr.bf16.mxu0 %v3430_v18  ;;  %2635 = vmatprep.subr.bf16.mxu1 %v3430_v18 }
  0x70   : > { %2605 = vmatpush3.bf16.msra.mxu0 %v3430_v18  ;;  %2637 = vmatpush3.bf16.msra.mxu1 %v3430_v18 }
  0x71   : > { %2607 = vmatprep.subr.bf16.mxu0 %v3436_v21  ;;  %2639 = vmatprep.subr.bf16.mxu1 %v3436_v21 }
  0x74   : > { %2609 = vmatpush3.bf16.msra.mxu0 %v3436_v21  ;;  %2641 = vmatpush3.bf16.msra.mxu1 %v3436_v21 }
  0x75   : > { %2611 = vmatprep.subr.bf16.mxu0 %v3442_v24  ;;  %2643 = vmatprep.subr.bf16.mxu1 %v3442_v24 }
  0x78   : > { %2613 = vmatpush3.bf16.msra.mxu0 %v3442_v24  ;;  %2645 = vmatpush3.bf16.msra.mxu1 %v3442_v24 }
  0x79   : > { %2679 = vmatprep.subr.bf16.mxu1 %v3402_v3 }
  0x7b   : > { %2231 = vmatmul.mubr.f32.vlgmr.msra.gmra.mrb[0].mxu0 %v225_v25 }
  0x7c   : > { %2233 = vmatprep.mubr.f32.mxu0 %v226_v26 }
  0x7f   : > { %2234 = vmatmul.mubr.f32.gmra.mrb[2].mxu0 %v227_v27 }
  0x80   : > { %2236 = vmatprep.mubr.f32.mxu0 %v228_v28 }
  0x83   : > { %2237 = vmatmul.mubr.f32.gmra.mrb[4].mxu0 %v229_v29 }
  0x84   : > { %2239 = vmatprep.mubr.f32.mxu0 %v230_v30 }
  0x87   : > { %2240 = vmatmul.mubr.f32.gmra.mrb[6].mxu0 %v231_v31 }
  0x88   : > { %2242 = vmatprep.mubr.f32.mxu0 %v232_v32 }
  0x8b   : > { %2243 = vmatmul.mubr.f32.gmra.mrb[8].mxu0 %v233_v33 }
  0x8c   : > { %2245 = vmatprep.mubr.f32.mxu0 %v234_v34 }
  0x8f   : > { %2246 = vmatmul.mubr.f32.gmra.mrb[10].mxu0 %v235_v35 }
  0x90   : > { %2248 = vmatprep.mubr.f32.mxu0 %v236_v36 }
  0x93   : > { %2249 = vmatmul.mubr.f32.gmra.mrb[12].mxu0 %v237_v37 }
  0x94   : > { %2251 = vmatprep.mubr.f32.mxu0 %v238_v38 }
  0x97   : > { %2252 = vmatmul.mubr.f32.gmra.mrb[14].mxu0 %v239_v39 }
  0x98   : > { %2254 = vmatprep.mubr.f32.mxu0 %v240_v40 }
  0x9b   : > { %2255 = vmatmul.mubr.f32.gmra.mrb[16].mxu0 %v241_v41 }
  0x9c   : > { %2257 = vmatprep.mubr.f32.mxu0 %v242_v42 }
  0x9f   : > { %2258 = vmatmul.mubr.f32.gmra.mrb[18].mxu0 %v243_v43 }
  0xa0   : > { %2260 = vmatprep.mubr.f32.mxu0 %v244_v44 }
  0xa3   : > { %2261 = vmatmul.mubr.f32.gmra.mrb[20].mxu0 %v245_v45 }
  0xa4   : > { %2263 = vmatprep.mubr.f32.mxu0 %v246_v46 }
  0xa7   : > { %2264 = vmatmul.mubr.f32.gmra.mrb[22].mxu0 %v247_v47 }
  0xa8   : > { %2266 = vmatprep.mubr.f32.mxu0 %v248_v48 }
  0xab   : > { %2267 = vmatmul.mubr.f32.gmra.mrb[24].mxu0 %v249_v49 }
  0xac   : > { %2269 = vmatprep.mubr.f32.mxu0 %v250_v50 }
  0xaf   : > { %2270 = vmatmul.mubr.f32.gmra.mrb[26].mxu0 %v251_v51 }
  0xb0   : > { %2272 = vmatprep.mubr.f32.mxu0 %v252_v52 }
  0xb3   : > { %2273 = vmatmul.mubr.f32.gmra.mrb[28].mxu0 %v253_v53 }
  0xb4   : > { %2275 = vmatprep.mubr.f32.mxu0 %v254_v54 }
  0xb7   : > { %2276 = vmatmul.mubr.f32.gmra.mrb[30].mxu0 %v255_v55 }
 0x14e   : > { %v2232_v57 = vpop.f32.mrb[0].mxu0 }
 0x14f   : > { %v328_v58 = vpop.f32.mrb[1].mxu0  ;;  %v3490_v60 = vadd.f32 %v2232_v57, %v3486_v56 }
 0x150   : > { %v329_v59 = vadd.f32 %v3486_v56, %v328_v58 }
 0x152   : > { %v1884_v61 = vmul.f32 -1.442695, %v329_v59  ;;  %v2235_v62 = vpop.f32.mrb[2].mxu0  ;;  %2310 = vmatprep.mubr.f32.mxu1 %v329_v59 }
 0x153   : > { %v338_v63 = vpop.f32.mrb[3].mxu0  ;;  %2311 = vmatmul.mubr.f32.vlgmr.msra.gmra.mrb[0].mxu1 %v3490_v60  ;;  %v3498_v1 = vadd.f32 %v2235_v62, %v3486_v56 }
 0x154   : > { %2835 = vpow2.f32 %v1884_v61  ;;  %v3494_v0 = vadd.f32 %v3486_v56, %v338_v63  ;;  %2681 = vmatpush3.bf16.msra.mxu1 %v3402_v3 }
 0x155   : > { %2683 = vmatprep.subr.bf16.mxu1 %v3404_v5 }
 0x156   : > { %v2238_v2 = vpop.f32.mrb[4].mxu0  ;;  %2313 = vmatprep.mubr.f32.mxu1 %v3494_v0 }
 0x157   : > { %v348_v4 = vpop.f32.mrb[5].mxu0  ;;  %2314 = vmatmul.mubr.f32.gmra.mrb[2].mxu1 %v3498_v1  ;;  %v3508_v7 = vadd.f32 %v2238_v2, %v3486_v56 }
 0x158   : > { %v3504_v6 = vadd.f32 %v3486_v56, %v348_v4  ;;  %2685 = vmatpush3.bf16.msra.mxu1 %v3404_v5 }
 0x159   : > { %2687 = vmatprep.subr.bf16.mxu1 %v3411_v8 }
 0x15a   : > { %v2241_v9 = vpop.f32.mrb[6].mxu0  ;;  %2316 = vmatprep.mubr.f32.mxu1 %v3504_v6 }
 0x15b   : > { %v358_v10 = vpop.f32.mrb[7].mxu0  ;;  %2317 = vmatmul.mubr.f32.gmra.mrb[4].mxu1 %v3508_v7  ;;  %v3518_v13 = vadd.f32 %v2241_v9, %v3486_v56 }
 0x15c   : > { %v3514_v11 = vadd.f32 %v3486_v56, %v358_v10  ;;  %2689 = vmatpush3.bf16.msra.mxu1 %v3411_v8 }
 0x15d   : > { %2691 = vmatprep.subr.bf16.mxu1 %v3418_v12 }
 0x15e   : > { %v2836_v14 = vpop.eup %2835  ;;  %v2244_v16 = vpop.f32.mrb[8].mxu0  ;;  %2319 = vmatprep.mubr.f32.mxu1 %v3514_v11 }
 0x15f   : > { %v808_v17 = vadd.f32 1.0, %v2836_v14  ;;  %v368_v19 = vpop.f32.mrb[9].mxu0  ;;  %2320 = vmatmul.mubr.f32.gmra.mrb[6].mxu1 %v3518_v13  ;;  %v3528_v22 = vadd.f32 %v2244_v16, %v3486_v56 }
 0x160   : > { %v3524_v20 = vadd.f32 %v3486_v56, %v368_v19  ;;  %2693 = vmatpush3.bf16.msra.mxu1 %v3418_v12 }
 0x161   : > { %2837 = vrcp.f32 %v808_v17  ;;  %2695 = vmatprep.subr.bf16.mxu1 %v3424_v15 }
 0x162   : > { %v2247_v23 = vpop.f32.mrb[10].mxu0  ;;  %2322 = vmatprep.mubr.f32.mxu1 %v3524_v20 }
 0x163   : > { %v378_v25 = vpop.f32.mrb[11].mxu0  ;;  %2323 = vmatmul.mubr.f32.gmra.mrb[8].mxu1 %v3528_v22  ;;  %v3538_v27 = vadd.f32 %v2247_v23, %v3486_v56 }
 0x164   : > { %v3534_v26 = vadd.f32 %v3486_v56, %v378_v25  ;;  %2697 = vmatpush3.bf16.msra.mxu1 %v3424_v15 }
 0x165   : > { %2699 = vmatprep.subr.bf16.mxu1 %v3430_v18 }
 0x166   : > { %v2250_v28 = vpop.f32.mrb[12].mxu0  ;;  %2325 = vmatprep.mubr.f32.mxu1 %v3534_v26 }
 0x167   : > { %v388_v29 = vpop.f32.mrb[13].mxu0  ;;  %2326 = vmatmul.mubr.f32.gmra.mrb[10].mxu1 %v3538_v27  ;;  %v3548_v31 = vadd.f32 %v2250_v28, %v3486_v56 }
 0x168   : > { %v3544_v30 = vadd.f32 %v3486_v56, %v388_v29  ;;  %2701 = vmatpush3.bf16.msra.mxu1 %v3430_v18  ;;  %v1886_v18 = vmul.f32 -1.442695, %v3494_v0 }
 0x169   : > { %2703 = vmatprep.subr.bf16.mxu1 %v3436_v21 }
 0x16a   : > { %v2253_v32 = vpop.f32.mrb[14].mxu0  ;;  %2328 = vmatprep.mubr.f32.mxu1 %v3544_v30 }
 0x16b   : > { %v2838_v33 = vpop.eup %2837  ;;  %v3553_v34 = vadd.f32 %v2253_v32, %v3486_v56  ;;  %v398_v35 = vpop.f32.mrb[15].mxu0  ;;  %2329 = vmatmul.mubr.f32.gmra.mrb[12].mxu1 %v3548_v31 }
 0x16c   : > { %v3557_v36 = vadd.f32 %v3486_v56, %v398_v35  ;;  %v904_v37 = vmul.f32 %v2838_v33, %v329_v59  ;;  %2705 = vmatpush3.bf16.msra.mxu1 %v3436_v21 }
 0x16d   : > { %2707 = vmatprep.subr.bf16.mxu1 %v3442_v24 }
 0x16e   : > { %2331 = vmatprep.mubr.f32.mxu1 %v3557_v36  ;;  %2390 = vmatprep.mubr.f32.mxu0 %v904_v37  ;;  %v2256_v38 = vpop.f32.mrb[16].mxu0 }
 0x16f   : > { %2332 = vmatmul.mubr.f32.gmra.mrb[14].mxu1 %v3553_v34  ;;  %v3564_v39 = vadd.f32 %v2256_v38, %v3486_v56  ;;  %v408_v40 = vpop.f32.mrb[17].mxu0 }
 0x170   : > { %v3567_v41 = vadd.f32 %v3486_v56, %v408_v40  ;;  %2709 = vmatpush3.bf16.msra.mxu1 %v3442_v24 }
 0x171   : > { %2743 = vmatprep.subr.bf16.mxu1 %v3402_v3 }
 0x172   : > { %2334 = vmatprep.mubr.f32.mxu1 %v3567_v41  ;;  %v2259_v42 = vpop.f32.mrb[18].mxu0 }
 0x173   : > { %2335 = vmatmul.mubr.f32.gmra.mrb[16].mxu1 %v3564_v39  ;;  %v3574_v43 = vadd.f32 %v2259_v42, %v3486_v56  ;;  %v418_v44 = vpop.f32.mrb[19].mxu0 }
 0x174   : > { %v3577_v45 = vadd.f32 %v3486_v56, %v418_v44 }
 0x176   : > { %2337 = vmatprep.mubr.f32.mxu1 %v3577_v45  ;;  %v2262_v46 = vpop.f32.mrb[20].mxu0 }
 0x177   : > { %2338 = vmatmul.mubr.f32.gmra.mrb[18].mxu1 %v3574_v43  ;;  %v3582_v47 = vadd.f32 %v2262_v46, %v3486_v56  ;;  %v428_v48 = vpop.f32.mrb[21].mxu0 }
 0x178   : > { %v3585_v49 = vadd.f32 %v3486_v56, %v428_v48 }
 0x17a   : > { %2340 = vmatprep.mubr.f32.mxu1 %v3585_v49  ;;  %v2265_v50 = vpop.f32.mrb[22].mxu0 }
 0x17b   : > { %2341 = vmatmul.mubr.f32.gmra.mrb[20].mxu1 %v3582_v47  ;;  %v3590_v51 = vadd.f32 %v2265_v50, %v3486_v56  ;;  %v438_v52 = vpop.f32.mrb[23].mxu0 }
 0x17c   : > { %v3593_v53 = vadd.f32 %v3486_v56, %v438_v52 }
 0x17e   : > { %2343 = vmatprep.mubr.f32.mxu1 %v3593_v53  ;;  %v2268_v54 = vpop.f32.mrb[24].mxu0 }
 0x17f   : > { %2344 = vmatmul.mubr.f32.gmra.mrb[22].mxu1 %v3590_v51  ;;  %v3598_v55 = vadd.f32 %v2268_v54, %v3486_v56  ;;  %v448_v57 = vpop.f32.mrb[25].mxu0  ;;  %v1885_v54 = vmul.f32 -1.442695, %v3490_v60 }
 0x180   : > { %v3601_v58 = vadd.f32 %v3486_v56, %v448_v57 }
 0x181   : > { %4105 = vst [vmem:[#allocation19_spill] sm:$0xff] %v3598_v55 }
 0x182   : > { %2346 = vmatprep.mubr.f32.mxu1 %v3601_v58  ;;  %v2271_v59 = vpop.f32.mrb[26].mxu0 }
 0x183   : > { %2347 = vmatmul.mubr.f32.gmra.mrb[24].mxu1 %v3598_v55  ;;  %v3606_v61 = vadd.f32 %v2271_v59, %v3486_v56  ;;  %v458_v62 = vpop.f32.mrb[27].mxu0  ;;  %v1887_v59 = vmul.f32 -1.442695, %v3498_v1 }
 0x184   : > { %v3609_v63 = vadd.f32 %v3486_v56, %v458_v62 }
 0x185   : > { %4106 = vst [vmem:[#allocation20_spill] sm:$0xff] %v3606_v61 }
 0x186   : > { %4107 = vst [vmem:[#allocation21_spill] sm:$0xff] %v3609_v63  ;;  %2349 = vmatprep.mubr.f32.mxu1 %v3609_v63  ;;  %v2274_v2 = vpop.f32.mrb[28].mxu0 }
 0x187   : > { %2350 = vmatmul.mubr.f32.gmra.mrb[26].mxu1 %v3606_v61  ;;  %v3614_v4 = vadd.f32 %v2274_v2, %v3486_v56  ;;  %v468_v9 = vpop.f32.mrb[29].mxu0 }
 0x188   : > { %v3617_v10 = vadd.f32 %v3486_v56, %v468_v9 }
 0x189   : > { %4108 = vst [vmem:[#allocation22_spill] sm:$0xff] %v3614_v4 }
 0x18a   : > { %4109 = vst [vmem:[#allocation23_spill] sm:$0xff] %v3617_v10  ;;  %2352 = vmatprep.mubr.f32.mxu1 %v3617_v10  ;;  %v2277_v14 = vpop.f32.mrb[30].mxu0 }
 0x18b   : > { %2353 = vmatmul.mubr.f32.gmra.mrb[28].mxu1 %v3614_v4  ;;  %v3622_v16 = vadd.f32 %v2277_v14, %v3486_v56  ;;  %v478_v17 = vpop.f32.mrb[31].mxu0 }
 0x18c   : > { %v3625_v19 = vadd.f32 %v3486_v56, %v478_v17 }
 0x18d   : > { %4110 = vst [vmem:[#allocation24_spill] sm:$0xff] %v3622_v16 }
 0x18e   : > { %4111 = vst [vmem:[#allocation25_spill] sm:$0xff] %v3625_v19  ;;  %2355 = vmatprep.mubr.f32.mxu1 %v3625_v19 }
 0x18f   : > { %2356 = vmatmul.mubr.f32.gmra.mrb[30].mxu1 %v3622_v16 }
 0x226   : > { %v2312_v23 = vpop.f32.mrb[0].mxu1 }
 0x227   : > { %v3630_v25 = vadd.f32 %v2312_v23, %v3486_v56  ;;  %v553_v28 = vpop.f32.mrb[1].mxu1 }
 0x228   : > { %v3633_v29 = vadd.f32 %v3486_v56, %v553_v28 }
 0x229   : > { %v1917_v32 = vmul.f32 -1.442695, %v3630_v25 }
 0x22a   : > { %v1916_v33 = vmul.f32 -1.442695, %v3633_v29  ;;  %v2315_v35 = vpop.f32.mrb[2].mxu1 }
 0x22b   : > { %2839 = vpow2.f32 %v1917_v32  ;;  %v3638_v37 = vadd.f32 %v2315_v35, %v3486_v56  ;;  %v563_v38 = vpop.f32.mrb[3].mxu1 }
 0x22c   : > { %2841 = vpow2.f32 %v1916_v33  ;;  %v3641_v40 = vadd.f32 %v3486_v56, %v563_v38 }
 0x22d   : > { %v1919_v42 = vmul.f32 -1.442695, %v3638_v37 }
 0x22e   : > { %v1918_v44 = vmul.f32 -1.442695, %v3641_v40  ;;  %v2318_v46 = vpop.f32.mrb[4].mxu1 }
 0x22f   : > { %2843 = vpow2.f32 %v1919_v42  ;;  %v3646_v48 = vadd.f32 %v2318_v46, %v3486_v56  ;;  %v573_v50 = vpop.f32.mrb[5].mxu1 }
 0x230   : > { %2845 = vpow2.f32 %v1918_v44  ;;  %v3649_v52 = vadd.f32 %v3486_v56, %v573_v50 }
 0x231   : > { %v1921_v57 = vmul.f32 -1.442695, %v3646_v48 }
 0x232   : > { %v1920_v62 = vmul.f32 -1.442695, %v3649_v52  ;;  %v2321_v2 = vpop.f32.mrb[6].mxu1 }
 0x233   : > { %2847 = vpow2.f32 %v1921_v57  ;;  %v3656_v9 = vadd.f32 %v2321_v2, %v3486_v56  ;;  %v583_v14 = vpop.f32.mrb[7].mxu1 }
 0x234   : > { %2849 = vpow2.f32 %v1920_v62  ;;  %v3659_v17 = vadd.f32 %v3486_v56, %v583_v14 }
 0x235   : > { %v2840_v23 = vpop.eup %2839  ;;  %2851 = vpow2.f32 %v1885_v54  ;;  %v1923_v28 = vmul.f32 -1.442695, %v3656_v9 }
 0x236   : > { %v2842_v32 = vpop.eup %2841  ;;  %2853 = vpow2.f32 %v1887_v59  ;;  %v1033_v33 = vadd.f32 1.0, %v2840_v23  ;;  %v1922_v35 = vmul.f32 -1.442695, %v3659_v17  ;;  %v2324_v38 = vpop.f32.mrb[8].mxu1 }
 0x237   : > { %v1032_v42 = vadd.f32 1.0, %v2842_v32  ;;  %2855 = vpow2.f32 %v1923_v28  ;;  %v3664_v44 = vadd.f32 %v2324_v38, %v3486_v56  ;;  %v593_v46 = vpop.f32.mrb[9].mxu1 }
 0x238   : > { %2857 = vrcp.f32 %v1033_v33  ;;  %v3667_v50 = vadd.f32 %v3486_v56, %v593_v46 }
 0x239   : > { %v2844_v57 = vpop.eup %2843  ;;  %2859 = vrcp.f32 %v1032_v42  ;;  %v1925_v54 = vmul.f32 -1.442695, %v3664_v44 }
 0x23a   : > { %v2846_v62 = vpop.eup %2845  ;;  %v1035_v59 = vadd.f32 1.0, %v2844_v57  ;;  %2861 = vpow2.f32 %v1922_v35  ;;  %v1924_v2 = vmul.f32 -1.442695, %v3667_v50  ;;  %v2327_v14 = vpop.f32.mrb[10].mxu1 }
 0x23b   : > { %v1034_v23 = vadd.f32 1.0, %v2846_v62  ;;  %2863 = vpow2.f32 %v1925_v54  ;;  %v3672_v28 = vadd.f32 %v2327_v14, %v3486_v56  ;;  %v603_v32 = vpop.f32.mrb[11].mxu1 }
 0x23c   : > { %2865 = vrcp.f32 %v1035_v59  ;;  %v3675_v33 = vadd.f32 %v3486_v56, %v603_v32 }
 0x23d   : > { %v2848_v38 = vpop.eup %2847  ;;  %2867 = vrcp.f32 %v1034_v23  ;;  %v1927_v42 = vmul.f32 -1.442695, %v3672_v28 }
 0x23e   : > { %v2850_v46 = vpop.eup %2849  ;;  %v1037_v57 = vadd.f32 1.0, %v2848_v38  ;;  %2869 = vpow2.f32 %v1924_v2  ;;  %v1926_v35 = vmul.f32 -1.442695, %v3675_v33  ;;  %v2330_v24 = vpop.f32.mrb[12].mxu1 }
 0x23f   : > { %v3679_v62 = vpop.eup %2851  ;;  %v1036_v54 = vadd.f32 1.0, %v2850_v46  ;;  %2871 = vpow2.f32 %v1927_v42  ;;  %v3682_v14 = vadd.f32 %v2330_v24, %v3486_v56  ;;  %v613_v59 = vpop.f32.mrb[13].mxu1 }
 0x240   : > { %v3684_v32 = vpop.eup %2853  ;;  %2873 = vrcp.f32 %v1037_v57  ;;  %v3687_v23 = vadd.f32 %v3486_v56, %v613_v59 }
 0x241   : > { %v2856_v21 = vpop.eup %2855  ;;  %2875 = vrcp.f32 %v1036_v54  ;;  %v1929_v2 = vmul.f32 -1.442695, %v3682_v14 }
 0x242   : > { %v2858_v38 = vpop.eup %2857  ;;  %v1039_v15 = vadd.f32 1.0, %v2856_v21  ;;  %2877 = vpow2.f32 %v1926_v35  ;;  %v1928_v42 = vmul.f32 -1.442695, %v3687_v23  ;;  %v2333_v24 = vpop.f32.mrb[14].mxu1 }
 0x243   : > { %v2860_v46 = vpop.eup %2859  ;;  %v1129_v12 = vmul.f32 %v2858_v38, %v3630_v25  ;;  %2879 = vpow2.f32 %v1929_v2  ;;  %v3694_v57 = vadd.f32 %v2333_v24, %v3486_v56  ;;  %v623_v59 = vpop.f32.mrb[15].mxu1 }
 0x244   : > { %v2862_v8 = vpop.eup %2861  ;;  %v1128_v54 = vmul.f32 %v2860_v46, %v3633_v29  ;;  %2881 = vrcp.f32 %v1039_v15  ;;  %v3698_v5 = vadd.f32 %v3486_v56, %v623_v59 }
 0x245   : > { %v2864_v21 = vpop.eup %2863  ;;  %v1038_v35 = vadd.f32 1.0, %v2862_v8  ;;  %2883 = vpow2.f32 %v1928_v42  ;;  %v1931_v3 = vmul.f32 -1.442695, %v3694_v57 }
 0x246   : > { %v2866_v16 = vpop.eup %2865  ;;  %2885 = vpow2.f32 %v1886_v18  ;;  %v1041_v25 = vadd.f32 1.0, %v2864_v21  ;;  %v1930_v2 = vmul.f32 -1.442695, %v3698_v5  ;;  %v2646_v38 = vpack.c.bf16 %v1129_v12, %v1128_v54  ;;  %v2336_v24 = vpop.f32.mrb[16].mxu1 }
 0x247   : > { %v2868_v19 = vpop.eup %2867  ;;  %v1131_v4 = vmul.f32 %v2866_v16, %v3638_v37  ;;  %2887 = vrcp.f32 %v1038_v35  ;;  %v3704_v15 = vadd.f32 %v2336_v24, %v3486_v56  ;;  %v633_v29 = vpop.f32.mrb[17].mxu1 }
 0x248   : > { %v2870_v46 = vpop.eup %2869  ;;  %v1130_v8 = vmul.f32 %v2868_v19, %v3641_v40  ;;  %2889 = vrcp.f32 %v1041_v25  ;;  %2647 = vmatprep.subr.bf16.mxu0 %v2646_v38  ;;  %v3708_v18 = vadd.f32 %v3486_v56, %v633_v29 }
 0x249   : > { %v2872_v42 = vpop.eup %2871  ;;  %v1040_v59 = vadd.f32 1.0, %v2870_v46  ;;  %2891 = vpow2.f32 %v1931_v3  ;;  %v1933_v12 = vmul.f32 -1.442695, %v3704_v15  ;;  %2649 = vmatpush3.bf16.xpose.msra.mxu0 %v2646_v38 }
 0x24a   : > { %v2874_v16 = vpop.eup %2873  ;;  %v1043_v37 = vadd.f32 1.0, %v2872_v42  ;;  %2893 = vpow2.f32 %v1930_v2  ;;  %v1932_v54 = vmul.f32 -1.442695, %v3708_v18  ;;  %v2650_v21 = vpack.c.bf16 %v1131_v4, %v1130_v8  ;;  %v2339_v35 = vpop.f32.mrb[18].mxu1 }
 0x24b   : > { %v2876_v24 = vpop.eup %2875  ;;  %v1133_v19 = vmul.f32 %v2874_v16, %v3646_v48  ;;  %2895 = vrcp.f32 %v1040_v59  ;;  %v3714_v40 = vadd.f32 %v2339_v35, %v3486_v56  ;;  %v643_v25 = vpop.f32.mrb[19].mxu1 }
 0x24c   : > { %v2878_v29 = vpop.eup %2877  ;;  %v1132_v3 = vmul.f32 %v2876_v24, %v3649_v52  ;;  %2897 = vrcp.f32 %v1043_v37  ;;  %2651 = vmatprep.subr.bf16.mxu0 %v2650_v21  ;;  %v3718_v38 = vadd.f32 %v3486_v56, %v643_v25 }
 0x24d   : > { %v2880_v2 = vpop.eup %2879  ;;  %v1042_v46 = vadd.f32 1.0, %v2878_v29  ;;  %2899 = vpow2.f32 %v1933_v12  ;;  %v1935_v4 = vmul.f32 -1.442695, %v3714_v40 }
 0x24e   : > { %v2882_v8 = vpop.eup %2881  ;;  %v1045_v48 = vadd.f32 1.0, %v2880_v2  ;;  %2901 = vpow2.f32 %v1932_v54  ;;  %v2654_v42 = vpack.c.bf16 %v1133_v19, %v1132_v3  ;;  %v2342_v59 = vpop.f32.mrb[20].mxu1  ;;  %v1934_v35 = vmul.f32 -1.442695, %v3718_v38 }
 0x24f   : > { %v2884_v16 = vpop.eup %2883  ;;  %2903 = vrcp.f32 %v1042_v46  ;;  %v3723_v52 = vadd.f32 %v2342_v59, %v3486_v56  ;;  %v653_v37 = vpop.f32.mrb[21].mxu1  ;;  %v1135_v25 = vmul.f32 %v2882_v8, %v3656_v9 }
 0x250   : > { %v3725_v24 = vpop.eup %2885  ;;  %2905 = vrcp.f32 %v1045_v48  ;;  %v1044_v12 = vadd.f32 1.0, %v2884_v16  ;;  %v3729_v29 = vadd.f32 %v3486_v56, %v653_v37 }
 0x251   : > { %v2888_v54 = vpop.eup %2887  ;;  %2907 = vpow2.f32 %v1935_v4  ;;  %2653 = vmatpush3.bf16.xpose.msra.mxu0 %v2650_v21  ;;  %v1937_v19 = vmul.f32 -1.442695, %v3723_v52 }
 0x252   : > { %v2890_v3 = vpop.eup %2889  ;;  %v1134_v2 = vmul.f32 %v2888_v54, %v3659_v17  ;;  %2909 = vrcp.f32 %v1044_v12  ;;  %2655 = vmatprep.subr.bf16.mxu0 %v2654_v42  ;;  %v1936_v46 = vmul.f32 -1.442695, %v3729_v29  ;;  %v2345_v59 = vpop.f32.mrb[22].mxu1 }
 0x253   : > { %v2892_v10 = vpop.eup %2891  ;;  %v1137_v9 = vmul.f32 %v2890_v3, %v3664_v44  ;;  %2911 = vpow2.f32 %v1934_v35  ;;  %v3736_v8 = vadd.f32 %v2345_v59, %v3486_v56  ;;  %v663_v48 = vpop.f32.mrb[23].mxu1 }
 0x254   : > { %v2894_v4 = vpop.eup %2893  ;;  %v1047_v21 = vadd.f32 1.0, %v2892_v10  ;;  %2913 = vpow2.f32 %v1937_v19  ;;  %v3738_v16 = vpack.c.bf16 %v1135_v25, %v1134_v2  ;;  %v3741_v17 = vadd.f32 %v3486_v56, %v663_v48 }
 0x255   : > { %v2896_v37 = vpop.eup %2895  ;;  %v1046_v12 = vadd.f32 1.0, %v2894_v4  ;;  %2915 = vpow2.f32 %v1936_v46  ;;  %v1939_v54 = vmul.f32 -1.442695, %v3736_v8 }
 0x256   : > { %v2898_v61 = vpop.eup %2897  ;;  %v1136_v44 = vmul.f32 %v2896_v37, %v3667_v50  ;;  %2917 = vrcp.f32 %v1047_v21  ;;  %v1938_v35 = vmul.f32 -1.442695, %v3741_v17  ;;  %v2348_v3 = vpop.f32.mrb[24].mxu1 }
 0x257   : > { %v2900_v59 = vpop.eup %2899  ;;  %v1139_v10 = vmul.f32 %v2898_v61, %v3672_v28  ;;  %2919 = vrcp.f32 %v1046_v12  ;;  %v3748_v25 = vadd.f32 %v2348_v3, %v3486_v56  ;;  %v673_v19 = vpop.f32.mrb[25].mxu1 }
 0x258   : > { %v2902_v2 = vpop.eup %2901  ;;  %v1049_v48 = vadd.f32 1.0, %v2900_v59  ;;  %2921 = vpow2.f32 %v1939_v54  ;;  %v3750_v46 = vpack.c.bf16 %v1137_v9, %v1136_v44  ;;  %v3753_v4 = vadd.f32 %v3486_v56, %v673_v19 }
 0x259   : > { %v2904_v50 = vpop.eup %2903  ;;  %v1048_v21 = vadd.f32 1.0, %v2902_v2  ;;  %2657 = vmatpush3.bf16.xpose.msra.mxu0 %v2654_v42  ;;  %2923 = vpow2.f32 %v1938_v35  ;;  %v1941_v37 = vmul.f32 -1.442695, %v3748_v25 }
 0x25a   : > { %v2906_v61 = vpop.eup %2905  ;;  %v1138_v28 = vmul.f32 %v2904_v50, %v3675_v33  ;;  %2925 = vrcp.f32 %v1049_v48  ;;  %2659 = vmatprep.subr.bf16.mxu0 %v3738_v16  ;;  %v1940_v12 = vmul.f32 -1.442695, %v3753_v4  ;;  %v2351_v54 = vpop.f32.mrb[26].mxu1 }
 0x25b   : > { %v2908_v9 = vpop.eup %2907  ;;  %v1141_v44 = vmul.f32 %v2906_v61, %v3682_v14  ;;  %2927 = vrcp.f32 %v1048_v21  ;;  %v3761_v3 = vadd.f32 %v2351_v54, %v3486_v56  ;;  %v683_v42 = vpop.f32.mrb[27].mxu1 }
 0x25c   : > { %v2910_v35 = vpop.eup %2909  ;;  %v1051_v59 = vadd.f32 1.0, %v2908_v9  ;;  %2929 = vpow2.f32 %v1941_v37  ;;  %v3763_v19 = vpack.c.bf16 %v1139_v10, %v1138_v28  ;;  %v3766_v33 = vadd.f32 %v3486_v56, %v683_v42 }
 0x25d   : > { %v2912_v2 = vpop.eup %2911  ;;  %v1140_v48 = vmul.f32 %v2910_v35, %v3687_v23  ;;  %2931 = vpow2.f32 %v1940_v12  ;;  %v1943_v50 = vmul.f32 -1.442695, %v3761_v3 }
 0x25e   : > { %v2914_v14 = vpop.eup %2913  ;;  %2933 = vrcp.f32 %v1051_v59  ;;  %v1050_v21 = vadd.f32 1.0, %v2912_v2  ;;  %v1942_v61 = vmul.f32 -1.442695, %v3766_v33  ;;  %v2354_v54 = vpop.f32.mrb[28].mxu1 }
 0x25f   : > { %v2916_v63 = vpop.eup %2915  ;;  %v1053_v9 = vadd.f32 1.0, %v2914_v14  ;;  %2935 = vpow2.f32 %v1943_v50  ;;  %v3771_v10 = vpack.c.bf16 %v1141_v44, %v1140_v48  ;;  %v3774_v37 = vadd.f32 %v2354_v54, %v3486_v56  ;;  %v693_v28 = vpop.f32.mrb[29].mxu1 }
 0x260   : > { %v2918_v42 = vpop.eup %2917  ;;  %2937 = vrcp.f32 %v1050_v21  ;;  %v1052_v23 = vadd.f32 1.0, %v2916_v63  ;;  %v3777_v12 = vadd.f32 %v3486_v56, %v693_v28 }
 0x261   : > { %v2920_v35 = vpop.eup %2919  ;;  %v1143_v59 = vmul.f32 %v2918_v42, %v3694_v57  ;;  %2939 = vrcp.f32 %v1053_v9  ;;  %2661 = vmatpush3.bf16.xpose.msra.mxu0 %v3738_v16  ;;  %v1945_v2 = vmul.f32 -1.442695, %v3774_v37 }
 0x262   : > { %v2922_v44 = vpop.eup %2921  ;;  %v1142_v48 = vmul.f32 %v2920_v35, %v3698_v5  ;;  %2941 = vrcp.f32 %v1052_v23  ;;  %2663 = vmatprep.subr.bf16.mxu0 %v3750_v46  ;;  %v2357_v50 = vpop.f32.mrb[30].mxu1  ;;  %v1944_v21 = vmul.f32 -1.442695, %v3777_v12 }
 0x263   : > { %v2924_v14 = vpop.eup %2923  ;;  %v1055_v63 = vadd.f32 1.0, %v2922_v44  ;;  %2943 = vpow2.f32 %v1942_v61  ;;  %v3786_v54 = vadd.f32 %v2357_v50, %v3486_v56  ;;  %v703_v57 = vpop.f32.mrb[31].mxu1 }
 0x264   : > { %v2926_v9 = vpop.eup %2925  ;;  %v1054_v16 = vadd.f32 1.0, %v2924_v14  ;;  %2945 = vpow2.f32 %v1945_v2  ;;  %v3788_v28 = vpack.c.bf16 %v1143_v59, %v1142_v48  ;;  %v3791_v5 = vadd.f32 %v3486_v56, %v703_v57 }
 0x265   : > { %v2928_v42 = vpop.eup %2927  ;;  %v1145_v23 = vmul.f32 %v2926_v9, %v3704_v15  ;;  %2947 = vrcp.f32 %v1055_v63  ;;  %v1947_v61 = vmul.f32 -1.442695, %v3786_v54  ;;  %v1888_v15 = vmul.f32 -1.442695, %v3504_v6 }
 0x266   : > { %v2930_v35 = vpop.eup %2929  ;;  %v1144_v44 = vmul.f32 %v2928_v42, %v3708_v18  ;;  %2949 = vrcp.f32 %v1054_v16  ;;  %v1946_v2 = vmul.f32 -1.442695, %v3791_v5  ;;  %v1889_v57 = vmul.f32 -1.442695, %v3508_v7 }
 0x267   : > { %v2932_v50 = vpop.eup %2931  ;;  %v1057_v55 = vadd.f32 1.0, %v2930_v35  ;;  %2951 = vpow2.f32 %v1944_v21  ;;  %v1890_v16 = vmul.f32 -1.442695, %v3514_v11 }
 0x268   : > { %v2934_v59 = vpop.eup %2933  ;;  %v1056_v48 = vadd.f32 1.0, %v2932_v50  ;;  %2953 = vpow2.f32 %v1947_v61  ;;  %v3797_v56 = vpack.c.bf16 %v1145_v23, %v1144_v44  ;;  %v1891_v44 = vmul.f32 -1.442695, %v3518_v13 }
 0x269   : > { %v2936_v14 = vpop.eup %2935  ;;  %v1147_v63 = vmul.f32 %v2934_v59, %v3714_v40  ;;  %2955 = vrcp.f32 %v1057_v55  ;;  %2665 = vmatpush3.bf16.xpose.msra.mxu0 %v3750_v46 }
 0x26a   : > { %v2938_v18 = vpop.eup %2937  ;;  %2957 = vrcp.f32 %v1056_v48  ;;  %2667 = vmatprep.subr.bf16.mxu0 %v3763_v19  ;;  %v1059_v21 = vadd.f32 1.0, %v2936_v14 }
 0x26b   : > { %v2940_v9 = vpop.eup %2939  ;;  %v1146_v42 = vmul.f32 %v2938_v18, %v3718_v38  ;;  %2959 = vpow2.f32 %v1946_v2  ;;  %v1892_v38 = vmul.f32 -1.442695, %v3524_v20  ;;  %v809_v18 = vadd.f32 1.0, %v3679_v62 }
 0x26c   : > { %v2942_v23 = vpop.eup %2941  ;;  %v1149_v61 = vmul.f32 %v2940_v9, %v3723_v52  ;;  %2961 = vrcp.f32 %v1059_v21  ;;  %v1893_v9 = vmul.f32 -1.442695, %v3528_v22 }
 0x26d   : > { %v2944_v55 = vpop.eup %2943  ;;  %2963 = vpow2.f32 %v1888_v15  ;;  %v1148_v40 = vmul.f32 %v2942_v23, %v3729_v29  ;;  %v3808_v46 = vpack.c.bf16 %v1147_v63, %v1146_v42  ;;  %v1894_v23 = vmul.f32 -1.442695, %v3534_v26 }
 0x26e   : > { %v2946_v35 = vpop.eup %2945  ;;  %2965 = vpow2.f32 %v1889_v57  ;;  %v1058_v50 = vadd.f32 1.0, %v2944_v55  ;;  %v810_v55 = vadd.f32 1.0, %v3725_v24 }
 0x26f   : > { %v2948_v59 = vpop.eup %2947  ;;  %2967 = vpow2.f32 %v1890_v16  ;;  %v1061_v2 = vadd.f32 1.0, %v2946_v35  ;;  %v3812_v48 = vpack.c.bf16 %v1149_v61, %v1148_v40 }
 0x270   : > { %v2950_v52 = vpop.eup %2949  ;;  %v1151_v14 = vmul.f32 %v2948_v59, %v3736_v8  ;;  %2969 = vrcp.f32 %v1058_v50 }
 0x271   : > { %v2952_v15 = vpop.eup %2951  ;;  %v1150_v29 = vmul.f32 %v2950_v52, %v3741_v17  ;;  %2669 = vmatpush3.bf16.xpose.msra.mxu0 %v3763_v19  ;;  %2971 = vrcp.f32 %v1061_v2 }
 0x272   : > { %v2954_v63 = vpop.eup %2953  ;;  %2973 = vpow2.f32 %v1891_v44  ;;  %2671 = vmatprep.subr.bf16.mxu0 %v3771_v10  ;;  %v1060_v57 = vadd.f32 1.0, %v2952_v15  ;;  %v811_v44 = vadd.f32 1.0, %v3684_v32 }
 0x273   : > { %v2956_v21 = vpop.eup %2955  ;;  %2975 = vpow2.f32 %v1892_v38  ;;  %v1063_v16 = vadd.f32 1.0, %v2954_v63  ;;  %v3820_v8 = vpack.c.bf16 %v1151_v14, %v1150_v29  ;;  %v1897_v63 = vmul.f32 -1.442695, %v3548_v31 }
 0x274   : > { %v2958_v42 = vpop.eup %2957  ;;  %v1153_v17 = vmul.f32 %v2956_v21, %v3748_v25  ;;  %2977 = vrcp.f32 %v1060_v57  ;;  %v1895_v25 = vmul.f32 -1.442695, %v3538_v27 }
 0x275   : > { %v2960_v19 = vpop.eup %2959  ;;  %v1152_v62 = vmul.f32 %v2958_v42, %v3753_v4  ;;  %2979 = vrcp.f32 %v1063_v16  ;;  %v1896_v4 = vmul.f32 -1.442695, %v3544_v30 }
 0x276   : > { %v2962_v61 = vpop.eup %2961  ;;  %2981 = vrcp.f32 %v809_v18  ;;  %v1062_v40 = vadd.f32 1.0, %v2960_v19  ;;  %v1899_v19 = vmul.f32 -1.442695, %v3553_v34 }
 0x277   : > { %v2964_v35 = vpop.eup %2963  ;;  %2983 = vpow2.f32 %v1893_v9  ;;  %v3827_v50 = vpack.c.bf16 %v1153_v17, %v1152_v62  ;;  %v1155_v2 = vmul.f32 %v2962_v61, %v3761_v3  ;;  %v1898_v3 = vmul.f32 -1.442695, %v3557_v36 }
 0x278   : > { %v2966_v59 = vpop.eup %2965  ;;  %2985 = vrcp.f32 %v1062_v40  ;;  %v812_v52 = vadd.f32 1.0, %v2964_v35  ;;  %v1900_v62 = vmul.f32 -1.442695, %v3567_v41 }
 0x279   : > { %v2968_v38 = vpop.eup %2967  ;;  %2987 = vpow2.f32 %v1894_v23  ;;  %2673 = vmatpush3.bf16.xpose.msra.mxu0 %v3771_v10  ;;  %v813_v14 = vadd.f32 1.0, %v2966_v59 }
 0x27a   : > { %v2970_v24 = vpop.eup %2969  ;;  %2989 = vrcp.f32 %v810_v55  ;;  %2675 = vmatprep.subr.bf16.mxu0 %v3788_v28  ;;  %v814_v9 = vadd.f32 1.0, %v2968_v38 }
 0x27b   : > { %v2972_v32 = vpop.eup %2971  ;;  %2991 = vrcp.f32 %v811_v44  ;;  %v1154_v15 = vmul.f32 %v2970_v24, %v3766_v33 }
 0x27c   : > { %v2974_v29 = vpop.eup %2973  ;;  %2993 = vpow2.f32 %v1895_v25  ;;  %v1157_v10 = vmul.f32 %v2972_v32, %v3774_v37 }
 0x27d   : > { %v2976_v18 = vpop.eup %2975  ;;  %2995 = vpow2.f32 %v1896_v4  ;;  %v3838_v57 = vpack.c.bf16 %v1155_v2, %v1154_v15  ;;  %v815_v42 = vadd.f32 1.0, %v2974_v29 }
 0x27e   : > { %v2978_v21 = vpop.eup %2977  ;;  %2997 = vrcp.f32 %v812_v52  ;;  %v816_v40 = vadd.f32 1.0, %v2976_v18 }
 0x27f   : > { %v2980_v16 = vpop.eup %2979  ;;  %2999 = vrcp.f32 %v813_v14  ;;  %v1156_v33 = vmul.f32 %v2978_v21, %v3777_v12 }
 0x280   : > { %v2982_v17 = vpop.eup %2981  ;;  %3001 = vpow2.f32 %v1897_v63  ;;  %v1159_v37 = vmul.f32 %v2980_v16, %v3786_v54 }
 0x281   : > { %v2984_v23 = vpop.eup %2983  ;;  %3003 = vpow2.f32 %v1898_v3  ;;  %2677 = vmatpush3.bf16.xpose.msra.mxu0 %v3788_v28  ;;  %v3845_v61 = vpack.c.bf16 %v1157_v10, %v1156_v33  ;;  %v905_v28 = vmul.f32 %v2982_v17, %v3490_v60 }
 0x282   : > { %v2986_v55 = vpop.eup %2985  ;;  %3005 = vrcp.f32 %v814_v9  ;;  %2711 = vmatprep.subr.bf16.mxu0 %v3797_v56  ;;  %v817_v25 = vadd.f32 1.0, %v2984_v23 }
 0x283   : > { %v2988_v12 = vpop.eup %2987  ;;  %3007 = vrcp.f32 %v815_v42  ;;  %v1158_v35 = vmul.f32 %v2986_v55, %v3791_v5 }
 0x284   : > { %v2990_v44 = vpop.eup %2989  ;;  %3009 = vpow2.f32 %v1899_v19  ;;  %v818_v4 = vadd.f32 1.0, %v2988_v12 }
 0x285   : > { %v2992_v59 = vpop.eup %2991  ;;  %3011 = vpow2.f32 %v1900_v62  ;;  %v3849_v38 = vpack.c.bf16 %v1159_v37, %v1158_v35  ;;  %v906_v24 = vmul.f32 %v2990_v44, %v3494_v0  ;;  %v1902_v35 = vmul.f32 -1.442695, %v3577_v45 }
 0x286   : > { %v2994_v54 = vpop.eup %2993  ;;  %3013 = vrcp.f32 %v816_v40  ;;  %v907_v60 = vmul.f32 %v2992_v59, %v3498_v1  ;;  %v1907_v44 = vmul.f32 -1.442695, %v3590_v51  ;;  %v1908_v59 = vmul.f32 -1.442695, %v3601_v58 }
 0x287   : > { %v2996_v2 = vpop.eup %2995  ;;  %3015 = vrcp.f32 %v817_v25  ;;  %v819_v5 = vadd.f32 1.0, %v2994_v54 }
 0x288   : > { %v2998_v52 = vpop.eup %2997  ;;  %2391 = vmatmul.mubr.f32.vlgmr.msra.gmra.mrb[32].mxu0 %v905_v28  ;;  %3017 = vrcp.f32 %v818_v4  ;;  %v820_v15 = vadd.f32 1.0, %v2996_v2  ;;  %v4112_v28 = vld [vmem:[#allocation19_spill] sm:$0xff]  ;;  %v4113_v2 = vld [vmem:[#allocation21_spill] sm:$0xff] }
 0x289   : > { %v3000_v32 = vpop.eup %2999  ;;  %2393 = vmatprep.mubr.f32.mxu0 %v906_v24  ;;  %2713 = vmatpush3.bf16.xpose.msra.mxu0 %v3797_v56  ;;  %v908_v63 = vmul.f32 %v2998_v52, %v3504_v6  ;;  %3019 = vrcp.f32 %v819_v5  ;;  %v1909_v4 = vmul.f32 -1.442695, %v4112_v28  ;;  %v1910_v24 = vmul.f32 -1.442695, %v4113_v2 }
 0x28a   : > { %v3002_v14 = vpop.eup %3001  ;;  %2715 = vmatprep.subr.bf16.mxu0 %v3808_v46  ;;  %3021 = vrcp.f32 %v820_v15  ;;  %v909_v56 = vmul.f32 %v3000_v32, %v3508_v7  ;;  %v4114_v15 = vld [vmem:[#allocation20_spill] sm:$0xff] }
 0x28b   : > { %v3004_v29 = vpop.eup %3003  ;;  %v821_v3 = vadd.f32 1.0, %v3002_v14 }
 0x28c   : > { %v3006_v18 = vpop.eup %3005  ;;  %2394 = vmatmul.mubr.f32.gmra.mrb[34].mxu0 %v907_v60  ;;  %v822_v21 = vadd.f32 1.0, %v3004_v29  ;;  %v1911_v60 = vmul.f32 -1.442695, %v4114_v15 }
 0x28d   : > { %v3008_v0 = vpop.eup %3007  ;;  %2396 = vmatprep.mubr.f32.mxu0 %v908_v63  ;;  %v910_v16 = vmul.f32 %v3006_v18, %v3514_v11  ;;  %3023 = vrcp.f32 %v821_v3  ;;  %v4116_v3 = vld [vmem:[#allocation22_spill] sm:$0xff] }
 0x28e   : > { %v3010_v10 = vpop.eup %3009  ;;  %3025 = vrcp.f32 %v822_v21  ;;  %v911_v33 = vmul.f32 %v3008_v0, %v3518_v13  ;;  %v4117_v21 = vld [vmem:[#allocation25_spill] sm:$0xff] }
 0x28f   : > { %v3012_v9 = vpop.eup %3011  ;;  %v823_v1 = vadd.f32 1.0, %v3010_v10  ;;  %v1913_v10 = vmul.f32 -1.442695, %v4116_v3 }
 0x290   : > { %v3014_v42 = vpop.eup %3013  ;;  %2397 = vmatmul.mubr.f32.gmra.mrb[36].mxu0 %v909_v56  ;;  %v824_v6 = vadd.f32 1.0, %v3012_v9  ;;  %v1914_v56 = vmul.f32 -1.442695, %v4117_v21 }
 0x291   : > { %2399 = vmatprep.mubr.f32.mxu0 %v910_v16  ;;  %2717 = vmatpush3.bf16.xpose.msra.mxu0 %v3808_v46  ;;  %v3016_v17 = vpop.eup %3015  ;;  %v912_v19 = vmul.f32 %v3014_v42, %v3524_v20  ;;  %3027 = vrcp.f32 %v823_v1 }
 0x292   : > { %2719 = vmatprep.subr.bf16.mxu0 %v3812_v48  ;;  %v3018_v7 = vpop.eup %3017  ;;  %3029 = vrcp.f32 %v824_v6  ;;  %v913_v11 = vmul.f32 %v3016_v17, %v3528_v22 }
 0x293   : > { %v3020_v23 = vpop.eup %3019  ;;  %v914_v62 = vmul.f32 %v3018_v7, %v3534_v26 }
 0x294   : > { %2400 = vmatmul.mubr.f32.gmra.mrb[38].mxu0 %v911_v33  ;;  %v3022_v46 = vpop.eup %3021  ;;  %v915_v13 = vmul.f32 %v3020_v23, %v3538_v27 }
 0x295   : > { %2402 = vmatprep.mubr.f32.mxu0 %v912_v19  ;;  %v916_v37 = vmul.f32 %v3022_v46, %v3544_v30 }
 0x297   : > { %v3024_v20 = vpop.eup %3023 }
 0x298   : > { %2403 = vmatmul.mubr.f32.gmra.mrb[40].mxu0 %v913_v11  ;;  %v3026_v55 = vpop.eup %3025  ;;  %v917_v22 = vmul.f32 %v3024_v20, %v3548_v31  ;;  %v1903_v31 = vmul.f32 -1.442695, %v3574_v43 }
 0x299   : > { %2405 = vmatprep.mubr.f32.mxu0 %v914_v62  ;;  %2721 = vmatpush3.bf16.xpose.msra.mxu0 %v3812_v48  ;;  %v918_v26 = vmul.f32 %v3026_v55, %v3557_v36  ;;  %v1901_v48 = vmul.f32 -1.442695, %v3564_v39  ;;  %v1904_v36 = vmul.f32 -1.442695, %v3585_v49 }
 0x29a   : > { %2723 = vmatprep.subr.bf16.mxu0 %v3820_v8 }
 0x29b   : > { %v3028_v40 = vpop.eup %3027  ;;  %3031 = vpow2.f32 %v1901_v48 }
 0x29c   : > { %2406 = vmatmul.mubr.f32.gmra.mrb[42].mxu0 %v915_v13  ;;  %v3030_v12 = vpop.eup %3029  ;;  %v919_v27 = vmul.f32 %v3028_v40, %v3553_v34  ;;  %3033 = vpow2.f32 %v1902_v35  ;;  %v1906_v34 = vmul.f32 -1.442695, %v3593_v53 }
 0x29d   : > { %2408 = vmatprep.mubr.f32.mxu0 %v916_v37  ;;  %v920_v30 = vmul.f32 %v3030_v12, %v3567_v41  ;;  %3035 = vpow2.f32 %v1903_v31 }
 0x29e   : > { %3037 = vpow2.f32 %v1904_v36 }
 0x2a0   : > { %2409 = vmatmul.mubr.f32.gmra.mrb[44].mxu0 %v917_v22 }
 0x2a1   : > { %2411 = vmatprep.mubr.f32.mxu0 %v918_v26  ;;  %2725 = vmatpush3.bf16.xpose.msra.mxu0 %v3820_v8  ;;  %v1905_v8 = vmul.f32 -1.442695, %v3582_v47 }
 0x2a2   : > { %2727 = vmatprep.subr.bf16.mxu0 %v3827_v50 }
 0x2a3   : > { %3039 = vpow2.f32 %v1905_v8 }
 0x2a4   : > { %2412 = vmatmul.mubr.f32.gmra.mrb[46].mxu0 %v919_v27  ;;  %3041 = vpow2.f32 %v1906_v34 }
 0x2a5   : > { %2502 = vmatprep.mubr.f32.mxu0 %v920_v30  ;;  %v3032_v41 = vpop.eup %3031  ;;  %3043 = vpow2.f32 %v1907_v44 }
 0x2a6   : > { %v825_v25 = vadd.f32 1.0, %v3032_v41  ;;  %3045 = vpow2.f32 %v1908_v59 }
 0x2a8   : > { %3047 = vrcp.f32 %v825_v25 }
 0x2a9   : > { %2729 = vmatpush3.bf16.xpose.msra.mxu0 %v3827_v50  ;;  %v3034_v50 = vpop.eup %3033  ;;  %3049 = vpow2.f32 %v1909_v4 }
 0x2aa   : > { %2731 = vmatprep.subr.bf16.mxu0 %v3838_v57  ;;  %v3036_v54 = vpop.eup %3035  ;;  %v826_v52 = vadd.f32 1.0, %v3034_v50  ;;  %3051 = vpow2.f32 %v1910_v24 }
 0x2ab   : > { %v3038_v32 = vpop.eup %3037  ;;  %v827_v5 = vadd.f32 1.0, %v3036_v54 }
 0x2ac   : > { %3053 = vrcp.f32 %v826_v52  ;;  %v828_v63 = vadd.f32 1.0, %v3038_v32 }
 0x2ad   : > { %v3040_v14 = vpop.eup %3039  ;;  %3055 = vrcp.f32 %v827_v5 }
 0x2ae   : > { %v3042_v18 = vpop.eup %3041  ;;  %v829_v0 = vadd.f32 1.0, %v3040_v14  ;;  %3057 = vpow2.f32 %v1911_v60  ;;  %v4119_v60 = vld [vmem:[#allocation11_spill] sm:$0xff] }
 0x2af   : > { %v3044_v9 = vpop.eup %3043  ;;  %v830_v16 = vadd.f32 1.0, %v3042_v18 }
 0x2b0   : > { %v3046_v42 = vpop.eup %3045  ;;  %v831_v33 = vadd.f32 1.0, %v3044_v9 }
 0x2b1   : > { %2733 = vmatpush3.bf16.xpose.msra.mxu0 %v3838_v57  ;;  %v4115_v57 = vld [vmem:[#allocation23_spill] sm:$0xff]  ;;  %v832_v19 = vadd.f32 1.0, %v3046_v42 }
 0x2b2   : > { %2735 = vmatprep.subr.bf16.mxu0 %v3845_v61  ;;  %v1912_v29 = vmul.f32 -1.442695, %v4115_v57  ;;  %v3048_v6 = vpop.eup %3047 }
 0x2b3   : > { %v3050_v17 = vpop.eup %3049  ;;  %v921_v13 = vmul.f32 %v3048_v6, %v3564_v39 }
 0x2b4   : > { %3059 = vpow2.f32 %v1912_v29  ;;  %v3052_v7 = vpop.eup %3051  ;;  %v833_v62 = vadd.f32 1.0, %v3050_v17  ;;  %v4120_v29 = vld [vmem:[#allocation12_spill] sm:$0xff]  ;;  %v4125_v17 = vld [vmem:[#allocation17_spill] sm:$0xff] }
 0x2b5   : > { %3061 = vrcp.f32 %v828_v63  ;;  %v834_v20 = vadd.f32 1.0, %v3052_v7 }
 0x2b6   : > { %3063 = vrcp.f32 %v829_v0  ;;  %v3054_v11 = vpop.eup %3053  ;;  %v4121_v0 = vld [vmem:[#allocation13_spill] sm:$0xff] }
 0x2b7   : > { %3065 = vpow2.f32 %v1913_v10  ;;  %v3056_v23 = vpop.eup %3055  ;;  %v922_v55 = vmul.f32 %v3054_v11, %v3577_v45  ;;  %v4126_v11 = vld [vmem:[#allocation18_spill] sm:$0xff] }
 0x2b8   : > { %3067 = vpow2.f32 %v1914_v56  ;;  %v3058_v46 = vpop.eup %3057  ;;  %v923_v48 = vmul.f32 %v3056_v23, %v3574_v43 }
 0x2b9   : > { %2737 = vmatpush3.bf16.xpose.msra.mxu0 %v3845_v61  ;;  %v4118_v61 = vld [vmem:[#allocation24_spill] sm:$0xff]  ;;  %3069 = vrcp.f32 %v830_v16  ;;  %v835_v40 = vadd.f32 1.0, %v3058_v46  ;;  %v4123_v16 = vld [vmem:[#allocation15_spill] sm:$0xff] }
 0x2ba   : > { %2739 = vmatprep.subr.bf16.mxu0 %v3849_v38  ;;  %v1915_v1 = vmul.f32 -1.442695, %v4118_v61 }
 0x2bc   : > { %3071 = vpow2.f32 %v1915_v1  ;;  %v4124_v1 = vld [vmem:[#allocation16_spill] sm:$0xff] }
 0x2bd   : > { %3073 = vrcp.f32 %v831_v33 }
 0x2be   : > { %3075 = vrcp.f32 %v832_v19  ;;  %v3060_v37 = vpop.eup %3059 }
 0x2bf   : > { %v3062_v22 = vpop.eup %3061  ;;  %3077 = vrcp.f32 %v833_v62  ;;  %v836_v12 = vadd.f32 1.0, %v3060_v37 }
 0x2c0   : > { %3079 = vrcp.f32 %v834_v20  ;;  %v924_v30 = vmul.f32 %v3062_v22, %v3585_v49 }
 0x2c1   : > { %2741 = vmatpush3.bf16.xpose.msra.mxu0 %v3849_v38  ;;  %v3064_v38 = vpop.eup %3063  ;;  %3081 = vrcp.f32 %v835_v40 }
 0x2c2   : > { %v3066_v26 = vpop.eup %3065  ;;  %3083 = vrcp.f32 %v836_v12  ;;  %v925_v36 = vmul.f32 %v3064_v38, %v3582_v47 }
 0x2c3   : > { %v3068_v27 = vpop.eup %3067  ;;  %v837_v35 = vadd.f32 1.0, %v3066_v26 }
 0x2c4   : > { %v3070_v39 = vpop.eup %3069  ;;  %v838_v31 = vadd.f32 1.0, %v3068_v27 }
 0x2c5   : > { %v926_v34 = vmul.f32 %v3070_v39, %v3593_v53  ;;  %3085 = vrcp.f32 %v837_v35 }
 0x2c6   : > { %v3072_v45 = vpop.eup %3071  ;;  %3087 = vrcp.f32 %v838_v31 }
 0x2c7   : > { %v3074_v8 = vpop.eup %3073  ;;  %v839_v43 = vadd.f32 1.0, %v3072_v45  ;;  %v3930_v45 = vld [vmem:[%s4052_s2] ss:$0 sm:$0xff] }
 0x2c8   : > { %2503 = vmatmul.mubr.f32.vlgmr.msra.gmra.mrb[48].mxu0 %v921_v13  ;;  %v3076_v41 = vpop.eup %3075  ;;  %v927_v49 = vmul.f32 %v3074_v8, %v3590_v51 }
 0x2c9   : > { %2505 = vmatprep.mubr.f32.mxu0 %v922_v55  ;;  %v3078_v44 = vpop.eup %3077  ;;  %v928_v59 = vmul.f32 %v3076_v41, %v3601_v58  ;;  %3089 = vrcp.f32 %v839_v43 }
 0x2ca   : > { %v3080_v50 = vpop.eup %3079  ;;  %v929_v47 = vmul.f32 %v3078_v44, %v4112_v28 }
 0x2cb   : > { %v3082_v25 = vpop.eup %3081  ;;  %v930_v53 = vmul.f32 %v3080_v50, %v4113_v2 }
 0x2cc   : > { %2506 = vmatmul.mubr.f32.gmra.mrb[50].mxu0 %v923_v48  ;;  %v3084_v54 = vpop.eup %3083  ;;  %v931_v4 = vmul.f32 %v3082_v25, %v4114_v15 }
 0x2cd   : > { %2508 = vmatprep.mubr.f32.mxu0 %v924_v30  ;;  %v932_v51 = vmul.f32 %v3084_v54, %v4115_v57 }
 0x2cf   : > { %v3086_v24 = vpop.eup %3085 }
 0x2d0   : > { %2509 = vmatmul.mubr.f32.gmra.mrb[52].mxu0 %v925_v36  ;;  %v3088_v52 = vpop.eup %3087  ;;  %v933_v58 = vmul.f32 %v3086_v24, %v4116_v3 }
 0x2d1   : > { %2511 = vmatprep.mubr.f32.mxu0 %v926_v34  ;;  %v934_v5 = vmul.f32 %v3088_v52, %v4117_v21  ;;  %v4122_v21 = vld [vmem:[#allocation14_spill] sm:$0xff] }
 0x2d3   : > { %v3090_v32 = vpop.eup %3089 }
 0x2d4   : > { %2512 = vmatmul.mubr.f32.gmra.mrb[54].mxu0 %v927_v49  ;;  %v935_v28 = vmul.f32 %v3090_v32, %v4118_v61 }
 0x2d5   : > { %2514 = vmatprep.mubr.f32.mxu0 %v928_v59 }
 0x2d8   : > { %2515 = vmatmul.mubr.f32.gmra.mrb[56].mxu0 %v929_v47 }
 0x2d9   : > { %2517 = vmatprep.mubr.f32.mxu0 %v930_v53 }
 0x2dc   : > { %2518 = vmatmul.mubr.f32.gmra.mrb[58].mxu0 %v931_v4 }
 0x2dd   : > { %2520 = vmatprep.mubr.f32.mxu0 %v932_v51 }
 0x2e0   : > { %2521 = vmatmul.mubr.f32.gmra.mrb[60].mxu0 %v933_v58 }
 0x2e1   : > { %2523 = vmatprep.mubr.f32.mxu0 %v934_v5 }
 0x2e4   : > { %2524 = vmatmul.mubr.f32.gmra.mrb[62].mxu0 %v935_v28 }
 0x35b   : > { %v2392_v2 = vpop.f32.mrb[32].mxu0 }
 0x35c   : > { %v1226_v14 = vpop.f32.mrb[33].mxu0 }
 0x35d   : > { %2446 = vmatprep.mubr.f32.mxu1 %v1226_v14 }
 0x35e   : > { %2447 = vmatmul.mubr.f32.vlgmr.msra.gmra.mrb[32].mxu1 %v2392_v2 }
 0x35f   : > { %v2395_v15 = vpop.f32.mrb[34].mxu0  ;;  %2745 = vmatpush3.bf16.msra.mxu1 %v4119_v60 }
 0x360   : > { %v1236_v57 = vpop.f32.mrb[35].mxu0  ;;  %2747 = vmatprep.subr.bf16.mxu1 %v4120_v29 }
 0x361   : > { %2449 = vmatprep.mubr.f32.mxu1 %v1236_v57 }
 0x362   : > { %2450 = vmatmul.mubr.f32.gmra.mrb[34].mxu1 %v2395_v15 }
 0x363   : > { %v2398_v63 = vpop.f32.mrb[36].mxu0  ;;  %2749 = vmatpush3.bf16.msra.mxu1 %v4120_v29 }
 0x364   : > { %v1246_v18 = vpop.f32.mrb[37].mxu0  ;;  %2751 = vmatprep.subr.bf16.mxu1 %v4121_v0 }
 0x365   : > { %2452 = vmatprep.mubr.f32.mxu1 %v1246_v18 }
 0x366   : > { %2453 = vmatmul.mubr.f32.gmra.mrb[36].mxu1 %v2398_v63 }
 0x367   : > { %v2401_v3 = vpop.f32.mrb[38].mxu0  ;;  %2753 = vmatpush3.bf16.msra.mxu1 %v4121_v0 }
 0x368   : > { %v1256_v10 = vpop.f32.mrb[39].mxu0  ;;  %2755 = vmatprep.subr.bf16.mxu1 %v4122_v21 }
 0x369   : > { %2455 = vmatprep.mubr.f32.mxu1 %v1256_v10 }
 0x36a   : > { %2456 = vmatmul.mubr.f32.gmra.mrb[38].mxu1 %v2401_v3 }
 0x36b   : > { %v2404_v56 = vpop.f32.mrb[40].mxu0  ;;  %2757 = vmatpush3.bf16.msra.mxu1 %v4122_v21 }
 0x36c   : > { %v1266_v9 = vpop.f32.mrb[41].mxu0  ;;  %2759 = vmatprep.subr.bf16.mxu1 %v4123_v16 }
 0x36d   : > { %2458 = vmatprep.mubr.f32.mxu1 %v1266_v9 }
 0x36e   : > { %2459 = vmatmul.mubr.f32.gmra.mrb[40].mxu1 %v2404_v56 }
 0x36f   : > { %v2407_v42 = vpop.f32.mrb[42].mxu0  ;;  %2761 = vmatpush3.bf16.msra.mxu1 %v4123_v16 }
 0x370   : > { %v1276_v61 = vpop.f32.mrb[43].mxu0  ;;  %2763 = vmatprep.subr.bf16.mxu1 %v4124_v1 }
 0x371   : > { %2461 = vmatprep.mubr.f32.mxu1 %v1276_v61 }
 0x372   : > { %2462 = vmatmul.mubr.f32.gmra.mrb[42].mxu1 %v2407_v42 }
 0x373   : > { %v2410_v6 = vpop.f32.mrb[44].mxu0  ;;  %2765 = vmatpush3.bf16.msra.mxu1 %v4124_v1 }
 0x374   : > { %v1286_v33 = vpop.f32.mrb[45].mxu0  ;;  %2767 = vmatprep.subr.bf16.mxu1 %v4125_v17 }
 0x375   : > { %2464 = vmatprep.mubr.f32.mxu1 %v1286_v33 }
 0x376   : > { %2465 = vmatmul.mubr.f32.gmra.mrb[44].mxu1 %v2410_v6 }
 0x377   : > { %v2413_v19 = vpop.f32.mrb[46].mxu0  ;;  %2769 = vmatpush3.bf16.msra.mxu1 %v4125_v17 }
 0x378   : > { %v1296_v7 = vpop.f32.mrb[47].mxu0  ;;  %2771 = vmatprep.subr.bf16.mxu1 %v4126_v11 }
 0x379   : > { %2467 = vmatprep.mubr.f32.mxu1 %v1296_v7 }
 0x37a   : > { %2468 = vmatmul.mubr.f32.gmra.mrb[46].mxu1 %v2413_v19 }
 0x37b   : > { %2773 = vmatpush3.bf16.msra.mxu1 %v4126_v11 }
 0x39b   : > { %v2504_v23 = vpop.f32.mrb[48].mxu0 }
 0x39c   : > { %v1532_v62 = vpop.f32.mrb[49].mxu0 }
 0x39d   : > { %2558 = vmatprep.mubr.f32.mxu1 %v1532_v62 }
 0x39e   : > { %2559 = vmatmul.mubr.f32.vlgmr.msra.gmra.mrb[48].mxu1 %v2504_v23 }
 0x39f   : > { %v2507_v46 = vpop.f32.mrb[50].mxu0 }
 0x3a0   : > { %v1542_v13 = vpop.f32.mrb[51].mxu0 }
 0x3a1   : > { %2561 = vmatprep.mubr.f32.mxu1 %v1542_v13 }
 0x3a2   : > { %2562 = vmatmul.mubr.f32.gmra.mrb[50].mxu1 %v2507_v46 }
 0x3a3   : > { %v2510_v20 = vpop.f32.mrb[52].mxu0 }
 0x3a4   : > { %v1552_v37 = vpop.f32.mrb[53].mxu0 }
 0x3a5   : > { %2564 = vmatprep.mubr.f32.mxu1 %v1552_v37 }
 0x3a6   : > { %2565 = vmatmul.mubr.f32.gmra.mrb[52].mxu1 %v2510_v20 }
 0x3a7   : > { %v2513_v55 = vpop.f32.mrb[54].mxu0 }
 0x3a8   : > { %v1562_v22 = vpop.f32.mrb[55].mxu0 }
 0x3a9   : > { %2567 = vmatprep.mubr.f32.mxu1 %v1562_v22 }
 0x3aa   : > { %2568 = vmatmul.mubr.f32.gmra.mrb[54].mxu1 %v2513_v55 }
 0x3ab   : > { %v2516_v38 = vpop.f32.mrb[56].mxu0 }
 0x3ac   : > { %v1572_v40 = vpop.f32.mrb[57].mxu0 }
 0x3ad   : > { %2570 = vmatprep.mubr.f32.mxu1 %v1572_v40 }
 0x3ae   : > { %2571 = vmatmul.mubr.f32.gmra.mrb[56].mxu1 %v2516_v38 }
 0x3af   : > { %v2519_v26 = vpop.f32.mrb[58].mxu0 }
 0x3b0   : > { %v1582_v12 = vpop.f32.mrb[59].mxu0 }
 0x3b1   : > { %2573 = vmatprep.mubr.f32.mxu1 %v1582_v12 }
 0x3b2   : > { %2574 = vmatmul.mubr.f32.gmra.mrb[58].mxu1 %v2519_v26 }
 0x3b3   : > { %v2522_v48 = vpop.f32.mrb[60].mxu0 }
 0x3b4   : > { %v1592_v27 = vpop.f32.mrb[61].mxu0 }
 0x3b5   : > { %2576 = vmatprep.mubr.f32.mxu1 %v1592_v27 }
 0x3b6   : > { %2577 = vmatmul.mubr.f32.gmra.mrb[60].mxu1 %v2522_v48 }
 0x3b7   : > { %v2525_v30 = vpop.f32.mrb[62].mxu0 }
 0x3b8   : > { %v1602_v39 = vpop.f32.mrb[63].mxu0 }
 0x3b9   : > { %2579 = vmatprep.mubr.f32.mxu1 %v1602_v39 }
 0x3ba   : > { %2580 = vmatmul.mubr.f32.gmra.mrb[62].mxu1 %v2525_v30 }
 0x431   : > { %v2448_v35 = vpop.f32.mrb[32].mxu1 }
 0x432   : > { %v1377_v31 = vadd.f32 %v3930_v45, %v2448_v35  ;;  %v1371_v36 = vpop.f32.mrb[33].mxu1 }
 0x433   : > { %v1372_v8 = vadd.f32 %v3930_v45, %v1371_v36 }
 0x434   : > { %1451 = vst [vmem:[%s3936_s4 + $0x8] sm:$0xff] %v1377_v31 }
 0x435   : > { %1450 = vst [vmem:[%s3936_s4] sm:$0xff] %v1372_v8  ;;  %v2451_v34 = vpop.f32.mrb[34].mxu1 }
 0x436   : > { %v1387_v41 = vadd.f32 %v3930_v45, %v2451_v34  ;;  %v1381_v43 = vpop.f32.mrb[35].mxu1 }
 0x437   : > { %v1382_v49 = vadd.f32 %v3930_v45, %v1381_v43 }
 0x438   : > { %1453 = vst [vmem:[%s3936_s4 + $0x18] sm:$0xff] %v1387_v41 }
 0x439   : > { %1452 = vst [vmem:[%s3936_s4 + $0x10] sm:$0xff] %v1382_v49  ;;  %v2454_v44 = vpop.f32.mrb[36].mxu1 }
 0x43a   : > { %v1397_v59 = vadd.f32 %v3930_v45, %v2454_v44  ;;  %v1391_v50 = vpop.f32.mrb[37].mxu1 }
 0x43b   : > { %v1392_v47 = vadd.f32 %v3930_v45, %v1391_v50 }
 0x43c   : > { %1455 = vst [vmem:[%s3936_s4 + $0x28] sm:$0xff] %v1397_v59 }
 0x43d   : > { %1454 = vst [vmem:[%s3936_s4 + $0x20] sm:$0xff] %v1392_v47  ;;  %v2457_v25 = vpop.f32.mrb[38].mxu1 }
 0x43e   : > { %v1407_v53 = vadd.f32 %v3930_v45, %v2457_v25  ;;  %v1401_v54 = vpop.f32.mrb[39].mxu1 }
 0x43f   : > { %v1402_v4 = vadd.f32 %v3930_v45, %v1401_v54 }
 0x440   : > { %1457 = vst [vmem:[%s3936_s4 + $0x38] sm:$0xff] %v1407_v53 }
 0x441   : > { %1456 = vst [vmem:[%s3936_s4 + $0x30] sm:$0xff] %v1402_v4  ;;  %v2460_v24 = vpop.f32.mrb[40].mxu1 }
 0x442   : > { %v1417_v51 = vadd.f32 %v3930_v45, %v2460_v24  ;;  %v1411_v52 = vpop.f32.mrb[41].mxu1 }
 0x443   : > { %v1412_v58 = vadd.f32 %v3930_v45, %v1411_v52 }
 0x444   : > { %1459 = vst [vmem:[%s3936_s4 + $0x48] sm:$0xff] %v1417_v51 }
 0x445   : > { %1458 = vst [vmem:[%s3936_s4 + $0x40] sm:$0xff] %v1412_v58  ;;  %v2463_v32 = vpop.f32.mrb[42].mxu1 }
 0x446   : > { %v1427_v5 = vadd.f32 %v3930_v45, %v2463_v32  ;;  %v1421_v28 = vpop.f32.mrb[43].mxu1 }
 0x447   : > { %v1422_v2 = vadd.f32 %v3930_v45, %v1421_v28 }
 0x448   : > { %1461 = vst [vmem:[%s3936_s4 + $0x58] sm:$0xff] %v1427_v5 }
 0x449   : > { %1460 = vst [vmem:[%s3936_s4 + $0x50] sm:$0xff] %v1422_v2  ;;  %v2466_v14 = vpop.f32.mrb[44].mxu1 }
 0x44a   : > { %v1437_v15 = vadd.f32 %v3930_v45, %v2466_v14  ;;  %v1431_v60 = vpop.f32.mrb[45].mxu1 }
 0x44b   : > { %v1432_v57 = vadd.f32 %v3930_v45, %v1431_v60 }
 0x44c   : > { %1463 = vst [vmem:[%s3936_s4 + $0x68] sm:$0xff] %v1437_v15 }
 0x44d   : > { %1462 = vst [vmem:[%s3936_s4 + $0x60] sm:$0xff] %v1432_v57  ;;  %v2469_v29 = vpop.f32.mrb[46].mxu1 }
 0x44e   : > { %v1447_v63 = vadd.f32 %v3930_v45, %v2469_v29  ;;  %v1441_v18 = vpop.f32.mrb[47].mxu1 }
 0x44f   : > { %v1442_v0 = vadd.f32 %v3930_v45, %v1441_v18 }
 0x450   : > { %1465 = vst [vmem:[%s3936_s4 + $0x78] sm:$0xff] %v1447_v63 }
 0x451   : > { %1464 = vst [vmem:[%s3936_s4 + $0x70] sm:$0xff] %v1442_v0 }
 0x471   : > { %v2560_v3 = vpop.f32.mrb[48].mxu1 }
 0x472   : > { %v1683_v10 = vadd.f32 %v3930_v45, %v2560_v3  ;;  %v1677_v21 = vpop.f32.mrb[49].mxu1 }
 0x473   : > { %v1678_v56 = vadd.f32 %v3930_v45, %v1677_v21 }
 0x474   : > { %1949 = vst [vmem:[%s3936_s4 + $0x88] sm:$0xff] %v1683_v10 }
 0x475   : > { %1948 = vst [vmem:[%s3936_s4 + $0x80] sm:$0xff] %v1678_v56  ;;  %v2563_v9 = vpop.f32.mrb[50].mxu1 }
 0x476   : > { %v1693_v16 = vadd.f32 %v3930_v45, %v2563_v9  ;;  %v1687_v42 = vpop.f32.mrb[51].mxu1 }
 0x477   : > { %v1688_v61 = vadd.f32 %v3930_v45, %v1687_v42 }
 0x478   : > { %1951 = vst [vmem:[%s3936_s4 + $0x98] sm:$0xff] %v1693_v16 }
 0x479   : > { %1950 = vst [vmem:[%s3936_s4 + $0x90] sm:$0xff] %v1688_v61  ;;  %v2566_v1 = vpop.f32.mrb[52].mxu1 }
 0x47a   : > { %v1703_v6 = vadd.f32 %v3930_v45, %v2566_v1  ;;  %v1697_v33 = vpop.f32.mrb[53].mxu1 }
 0x47b   : > { %v1698_v17 = vadd.f32 %v3930_v45, %v1697_v33 }
 0x47c   : > { %1953 = vst [vmem:[%s3936_s4 + $0xa8] sm:$0xff] %v1703_v6 }
 0x47d   : > { %1952 = vst [vmem:[%s3936_s4 + $0xa0] sm:$0xff] %v1698_v17  ;;  %v2569_v19 = vpop.f32.mrb[54].mxu1 }
 0x47e   : > { %v1713_v7 = vadd.f32 %v3930_v45, %v2569_v19  ;;  %v1707_v11 = vpop.f32.mrb[55].mxu1 }
 0x47f   : > { %v1708_v23 = vadd.f32 %v3930_v45, %v1707_v11 }
 0x480   : > { %1955 = vst [vmem:[%s3936_s4 + $0xb8] sm:$0xff] %v1713_v7 }
 0x481   : > { %1954 = vst [vmem:[%s3936_s4 + $0xb0] sm:$0xff] %v1708_v23  ;;  %v2572_v62 = vpop.f32.mrb[56].mxu1 }
 0x482   : > { %v1723_v46 = vadd.f32 %v3930_v45, %v2572_v62  ;;  %v1717_v13 = vpop.f32.mrb[57].mxu1 }
 0x483   : > { %v1718_v20 = vadd.f32 %v3930_v45, %v1717_v13 }
 0x484   : > { %1957 = vst [vmem:[%s3936_s4 + $0xc8] sm:$0xff] %v1723_v46 }
 0x485   : > { %1956 = vst [vmem:[%s3936_s4 + $0xc0] sm:$0xff] %v1718_v20  ;;  %v2575_v37 = vpop.f32.mrb[58].mxu1 }
 0x486   : > { %v1733_v55 = vadd.f32 %v3930_v45, %v2575_v37  ;;  %v1727_v22 = vpop.f32.mrb[59].mxu1 }
 0x487   : > { %v1728_v38 = vadd.f32 %v3930_v45, %v1727_v22 }
 0x488   : > { %1959 = vst [vmem:[%s3936_s4 + $0xd8] sm:$0xff] %v1733_v55 }
 0x489   : > { %1958 = vst [vmem:[%s3936_s4 + $0xd0] sm:$0xff] %v1728_v38  ;;  %v2578_v40 = vpop.f32.mrb[60].mxu1 }
 0x48a   : > { %v1743_v26 = vadd.f32 %v3930_v45, %v2578_v40  ;;  %v1737_v12 = vpop.f32.mrb[61].mxu1 }
 0x48b   : > { %v1738_v48 = vadd.f32 %v3930_v45, %v1737_v12 }
 0x48c   : > { %1961 = vst [vmem:[%s3936_s4 + $0xe8] sm:$0xff] %v1743_v26 }
 0x48d   : > { %1960 = vst [vmem:[%s3936_s4 + $0xe0] sm:$0xff] %v1738_v48  ;;  %v2581_v27 = vpop.f32.mrb[62].mxu1 }
 0x48e   : > { %v1753_v30 = vadd.f32 %v3930_v45, %v2581_v27  ;;  %v1747_v39 = vpop.f32.mrb[63].mxu1 }
 0x48f   : > { %v1748_v35 = vadd.f32 %v3930_v45, %v1747_v39 }
 0x490   : > { %1963 = vst [vmem:[%s3936_s4 + $0xf8] sm:$0xff] %v1753_v30 }
 0x491   : > { %1962 = vst [vmem:[%s3936_s4 + $0xf0] sm:$0xff] %v1748_v35 }
 0x492   : > { %3163 = shalt.err (!%p3160_p7)
}
 0x493   : > { %s3164_s7 = scalar_lea.hbm %s4002_s28, 4096  ;;  %s3168_s18 = scalar_lea.hbm %s4053_s3, 16384 }
 0x494   : > { %p3165_p9 = scmp.ne.s32.totalorder %s4002_s28, %s3164_s7  ;;  %p3169_p5 = scmp.lt.u32.totalorder %s4002_s28, %s4053_s3 }
 0x495   : > { %p3170_p10 = scmp.lt.u32.totalorder %s3168_s18, %s3164_s7  ;;  %p3172_p4 = scmp.lt.u32.totalorder %s3164_s7, %s4002_s28 }
 0x496   : > { %p3166_p1 = pnand %p3165_p9, %p3335_p12 }
 0x497   : > { %p3171_p2 = por %p3170_p10, %p3169_p5 }
 0x498   : > { %p3167_p0 = pneg %p3166_p1 }
 0x499   : > { %p3173_p6 = por %p3172_p4, %p3171_p2 }
 0x49b   : > { %p3174_p8 = pnand %p3173_p6, %p3167_p0 }
 0x49d   : > { %3177 = shalt.err (!%p3174_p8)
}
 0x49e   : > { %s3227_s9 = smov 128   ;;  %s3228_s4 = smov 8  }
 0x49f   : > { %2780 = dma.vmem_to_hbm [thread:$0]  (%p3335_p12), %s4004_s5, 4096, %s4002_s28, %s1774_s16, %s3227_s9, %s3227_s9, %s3228_s4  }
 0x4a0 PF: > { %p2797_p11 = scmp.ge.s32.totalorder %s3220_s15, 2  ;;  %s1803_s25 = sand.u32 1, %s3208_s12  }
 0x4a1   : > { %p4127_p13 = scmp.ne.s32.totalorder %s4087_s19, 0  ;;  %s1804_s11 = scalar_lea.sflag [#allocation4], %s1803_s25 }
 0x4a3   : > { %p2791_p3 = pnand %p2797_p11, %p4127_p13 }
 0x4a5   : > { %3203 = dma.done.wait (!%p2791_p3), %s1804_s11, 4096  }
 0x4a6   : > { %3205 = vsyncadd (!%p2791_p3), %s1804_s11, 4294963200  ;;  %p17_p7 = scmp.ge.s32.totalorder %s3302_s24, 6   ;;  %s4128_s12 = smov %s3212_s13 }
 0x4a7   : > { %s4129_s13 = smov %s3216_s14  ;;  %s4130_s14 = smov %s3331_s17 }
 0x4a8   : > { %s4131_s15 = smov %s3302_s24  ;;  %19 = sbr.rel (!%p17_p7) target bundleno = 6 (0x6), region = 82 }
 0x4af   :  { %1809 = vsyncpa [#allocation3], 1 }
 0x4b0   :  { %1811 = vsyncpa [#allocation3 + $0x1], 1 }
 0x4b1   :  { %1812 = vsyncpa [#allocation6], 1 }
 0x4b2   :  { %1813 = vsyncpa [#allocation4], 1 }
 0x4b3   :  { %1815 = vsyncpa [#allocation4 + $0x1], 1 }

</bundles_post_ra>
